<compile_context>
chip_gen: v6e
topology: v6e:2x2x1
jax: 0.10.0
libtpu: 0.0.40
codegen_flags: <defaults>
</compile_context>

<pallas_src>
import functools
import math

import jax
import jax.numpy as jnp
from jax.experimental import pallas as pl
from jax.experimental.pallas import tpu as pltpu

D_IN = 768
D_HID = 256
NEG_SLOPE = 0.01  # F.leaky_relu default


def classifier_kernel(xt_ref, w1t_ref, b1_ref, w2_ref, b2_ref, dom_ref, out_ref,
                      *, pos_weight, logit_threshold):
    # fc1 (transposed so B sits on the lane axis):
    #   hT = leaky_relu(w1^T @ x^T + b1)   -> (256, B) f32
    ht = jnp.dot(w1t_ref[...], xt_ref[...], preferred_element_type=jnp.float32)
    ht = ht + b1_ref[...]                      # (256, 1) broadcast along lanes
    ht = jnp.where(ht >= 0.0, ht, NEG_SLOPE * ht)

    # TODO(synk): nn.Dropout is identity in eval mode; training-mode dropout
    # (pltpu.prng_random_bits mask) is omitted here.

    # fc2: logits = w2_row @ hT + b2   -> (1, B), lane-dense
    logits = jnp.dot(w2_ref[...], ht, preferred_element_type=jnp.float32)
    logits = logits + b2_ref[...]

    y = dom_ref[...]                           # (1, B) float32 targets (0./1.)

    # BCEWithLogitsLoss with pos_weight (numerically stable):
    #   l_i = -( pos_weight * y * log(sigmoid(z)) + (1 - y) * log(1 - sigmoid(z)) )
    log_sig = -jnp.logaddexp(0.0, -logits)          # log(sigmoid(z))
    log_one_minus = -jnp.logaddexp(0.0, logits)     # log(1 - sigmoid(z))
    per_example = -(pos_weight * y * log_sig + (1.0 - y) * log_one_minus)
    loss = jnp.mean(per_example, axis=-1, keepdims=True)          # (1, 1) lane reduce

    # sigmoid(z) > t  <=>  z > logit(t); avoids an extra transcendental.
    pred = (logits > logit_threshold).astype(jnp.float32)          # (1, B)
    acc = jnp.mean((pred == y).astype(jnp.float32), axis=-1, keepdims=True)

    b = logits.shape[-1]
    out_ref[0:1, :] = logits
    out_ref[1:2, :] = pred
    out_ref[2:3, :] = jnp.broadcast_to(loss, (1, b))
    out_ref[3:4, :] = jnp.broadcast_to(acc, (1, b))


def classifier_forward(hidden, domain, params, *, pos_weight, threshold):
    """hidden: [B, S, 768] f32, domain: [B] int32. Returns (logits, loss, predict, acc)."""
    B = hidden.shape[0]
    w1, b1, w2, b2 = params

    # Wrapper-side glue. In a real deployment w1 would be stored pre-transposed /
    # bf16 so these casts/transposes happen once, not per call.
    xt = hidden[:, 0, :].astype(jnp.bfloat16).T          # (768, B) bf16
    w1t = w1.T.astype(jnp.bfloat16)                      # (256, 768) bf16
    b1_col = b1.reshape(D_HID, 1)                        # (256, 1)
    w2_row = w2.reshape(1, D_HID)                        # (1, 256)
    b2_11 = b2.reshape(1, 1)                             # (1, 1)
    dom_row = domain.astype(jnp.float32).reshape(1, B)   # (1, B)

    logit_thr = math.log(threshold / (1.0 - threshold))

    kernel = functools.partial(classifier_kernel,
                               pos_weight=float(pos_weight),
                               logit_threshold=float(logit_thr))

    full = lambda shape: pl.BlockSpec(shape, lambda: tuple(0 for _ in shape))

    bytes_accessed = (D_HID * D_IN * 2      # w1t bf16
                      + D_IN * B * 2        # xt bf16
                      + D_HID * 4 + D_HID * 4 + 4
                      + B * 4 + 4 * B * 4)
    # TODO(synk): for large eval batches, tile B over a grid (TB multiple of 128),
    # mark the batch axis "parallel" (v7x: 2 TCs) and accumulate loss/acc partials.
    out = pl.pallas_call(
        kernel,
        out_shape=jax.ShapeDtypeStruct((4, B), jnp.float32),
        grid_spec=pltpu.PrefetchScalarGridSpec(
            num_scalar_prefetch=0,
            grid=(),
            in_specs=[
                full((D_IN, B)),      # x^T
                full((D_HID, D_IN)),  # w1^T (bf16)
                full((D_HID, 1)),     # b1 column
                full((1, D_HID)),     # w2 row
                full((1, 1)),         # b2
                full((1, B)),         # domain row
            ],
            out_specs=full((4, B)),
        ),
        compiler_params=pltpu.CompilerParams(vmem_limit_bytes=8 * 1024 * 1024),
        cost_estimate=pl.CostEstimate(
            flops=2 * B * (D_IN * D_HID + D_HID),
            transcendentals=6 * B,
            bytes_accessed=bytes_accessed),
    )(xt, w1t, b1_col, w2_row, b2_11, dom_row)

    logits = out[0]                 # [B] f32
    predict = out[1] > 0.5          # bool [B]
    loss = out[2, 0]
    acc = out[3, 0]
    return logits, loss, predict, acc


def init_params(key):
    """Deterministic synthetic init for fc1 (768->256) and fc2 (256->1)."""
    k1, k2, k3, k4 = jax.random.split(key, 4)
    w1 = jax.random.normal(k1, (D_IN, D_HID), jnp.float32) * (1.0 / jnp.sqrt(D_IN))
    b1 = jax.random.normal(k2, (D_HID,), jnp.float32) * 0.01
    w2 = jax.random.normal(k3, (D_HID, 1), jnp.float32) * (1.0 / jnp.sqrt(D_HID))
    b2 = jax.random.normal(k4, (1,), jnp.float32) * 0.01
    return w1, b1, w2, b2


def reference_forward(hidden, domain, params, *, pos_weight, threshold,
                      matmul_dtype=jnp.float32):
    w1, b1, w2, b2 = params
    x = hidden[:, 0, :]
    h = jnp.dot(x.astype(matmul_dtype), w1.astype(matmul_dtype),
                preferred_element_type=jnp.float32) + b1
    h = jnp.where(h >= 0.0, h, NEG_SLOPE * h)
    logits = (jnp.dot(h, w2, preferred_element_type=jnp.float32) + b2)[:, 0]
    y = domain.astype(jnp.float32)
    log_sig = -jnp.logaddexp(0.0, -logits)
    log_1m = -jnp.logaddexp(0.0, logits)
    loss = jnp.mean(-(pos_weight * y * log_sig + (1.0 - y) * log_1m))
    predict = jax.nn.sigmoid(logits) > threshold
    acc = jnp.mean((predict.astype(jnp.int32) == domain).astype(jnp.float32))
    return logits, loss, predict, acc


if __name__ == "__main__":
    key = jax.random.PRNGKey(0)
    k_param, k_hid, k_dom = jax.random.split(key, 3)

    B, S = 8, 8
    pos_weight = 2.0
    threshold = 0.5

    params = init_params(k_param)
    hidden = jax.random.normal(k_hid, (B, S, D_IN), jnp.float32)
    domain = jax.random.bernoulli(k_dom, 0.5, (B,)).astype(jnp.int32)

    logits, loss, predict, acc = classifier_forward(
        hidden, domain, params, pos_weight=pos_weight, threshold=threshold)
    jax.block_until_ready((logits, loss, predict, acc))

    # f32 reference (module semantics): loose tolerance because the kernel runs
    # fc1 in bf16 (f32 accumulation).
    r32_logits, r32_loss, _, _ = reference_forward(
        hidden, domain, params, pos_weight=pos_weight, threshold=threshold)
    assert jnp.allclose(logits, r32_logits, atol=5e-2, rtol=5e-2)
    assert jnp.allclose(loss, r32_loss, atol=5e-2, rtol=5e-2)

    # Precision-matched reference (bf16 fc1): tight tolerance.
    rbf_logits, rbf_loss, _, _ = reference_forward(
        hidden, domain, params, pos_weight=pos_weight, threshold=threshold,
        matmul_dtype=jnp.bfloat16)
    assert jnp.allclose(logits, rbf_logits, atol=1e-2, rtol=1e-2)
    assert jnp.allclose(loss, rbf_loss, atol=1e-2, rtol=1e-2)

    # predict / acc consistency with the kernel's own logits (exact semantics).
    logit_thr = math.log(threshold / (1.0 - threshold))
    assert bool(jnp.all(predict == (logits > logit_thr)))
    acc_check = jnp.mean((predict.astype(jnp.int32) == domain).astype(jnp.float32))
    assert jnp.allclose(acc, acc_check, atol=1e-6)

    print("KERNEL_OK")
</pallas_src>

<mosaic_0001>
module attributes {stable_mosaic.version = 11 : i64} {
  func.func @classifier_kernel(%arg0: memref<768x8xbf16, #tpu.memory_space<vmem>>, %arg1: memref<256x768xbf16, #tpu.memory_space<vmem>>, %arg2: memref<256x1xf32, #tpu.memory_space<vmem>>, %arg3: memref<1x256xf32, #tpu.memory_space<vmem>>, %arg4: memref<1x1xf32, #tpu.memory_space<vmem>>, %arg5: memref<1x8xf32, #tpu.memory_space<vmem>>, %arg6: memref<4x8xf32, #tpu.memory_space<vmem>>) attributes {dimension_semantics = [], scalar_prefetch = 0 : i64, scratch_operands = 0 : i64, tpu.core_type = #tpu.core_type<tc>} {
    %c0 = arith.constant 0 : index
    %c0_0 = arith.constant 0 : index
    %0 = vector.load %arg1[%c0, %c0_0] : memref<256x768xbf16, #tpu.memory_space<vmem>>, vector<256x768xbf16>
    %c0_1 = arith.constant 0 : index
    %c0_2 = arith.constant 0 : index
    %1 = vector.load %arg0[%c0_1, %c0_2] : memref<768x8xbf16, #tpu.memory_space<vmem>>, vector<768x8xbf16>
    %cst = arith.constant dense<0.000000e+00> : vector<256x8xf32>
    %2 = tpu.matmul %0, %1, %cst {dimension_numbers = #tpu.dot_dimension_numbers<[1], [0], [0], [1], [0, 0, 1, 1], [], []>} : vector<256x768xbf16>, vector<768x8xbf16>, vector<256x8xf32> -> vector<256x8xf32>
    %c0_3 = arith.constant 0 : index
    %c0_4 = arith.constant 0 : index
    %3 = vector.load %arg2[%c0_3, %c0_4] : memref<256x1xf32, #tpu.memory_space<vmem>>, vector<256x1xf32>
    %4 = vector.broadcast %3 : vector<256x1xf32> to vector<256x8xf32>
    %5 = arith.addf %2, %4 : vector<256x8xf32>
    %cst_5 = arith.constant 0.000000e+00 : f32
    %6 = vector.broadcast %cst_5 : f32 to vector<256x8xf32>
    %7 = arith.cmpf oge, %5, %6 : vector<256x8xf32>
    %cst_6 = arith.constant 0.00999999977 : f32
    %8 = vector.broadcast %cst_6 : f32 to vector<256x8xf32>
    %9 = arith.mulf %8, %5 : vector<256x8xf32>
    %10 = arith.select %7, %5, %9 : vector<256x8xi1>, vector<256x8xf32>
    %c0_7 = arith.constant 0 : index
    %c0_8 = arith.constant 0 : index
    %11 = vector.load %arg3[%c0_7, %c0_8] : memref<1x256xf32, #tpu.memory_space<vmem>>, vector<1x256xf32>
    %cst_9 = arith.constant dense<0.000000e+00> : vector<1x8xf32>
    %12 = tpu.matmul %11, %10, %cst_9 {dimension_numbers = #tpu.dot_dimension_numbers<[1], [0], [0], [1], [0, 0, 1, 1], [], []>} : vector<1x256xf32>, vector<256x8xf32>, vector<1x8xf32> -> vector<1x8xf32>
    %c0_10 = arith.constant 0 : index
    %c0_11 = arith.constant 0 : index
    %13 = vector.load %arg4[%c0_10, %c0_11] : memref<1x1xf32, #tpu.memory_space<vmem>>, vector<1x1xf32>
    %14 = vector.broadcast %13 : vector<1x1xf32> to vector<1x8xf32>
    %15 = arith.addf %12, %14 : vector<1x8xf32>
    %c0_12 = arith.constant 0 : index
    %c0_13 = arith.constant 0 : index
    %16 = vector.load %arg5[%c0_12, %c0_13] : memref<1x8xf32, #tpu.memory_space<vmem>>, vector<1x8xf32>
    %cst_14 = arith.constant 0.000000e+00 : f32
    %17 = vector.broadcast %cst_14 : f32 to vector<1x8xf32>
    %18 = arith.subf %17, %15 : vector<1x8xf32>
    %cst_15 = arith.constant 0.000000e+00 : f32
    %19 = vector.broadcast %cst_15 : f32 to vector<1x8xf32>
    %20 = arith.maximumf %19, %18 : vector<1x8xf32>
    %21 = vector.broadcast %cst_15 : f32 to vector<1x8xf32>
    %22 = arith.subf %21, %18 : vector<1x8xf32>
    %23 = arith.cmpf one, %22, %22 : vector<1x8xf32>
    %24 = vector.broadcast %cst_15 : f32 to vector<1x8xf32>
    %25 = arith.addf %24, %18 : vector<1x8xf32>
    %26 = math.absf %22 : vector<1x8xf32>
    %cst_16 = arith.constant 0.000000e+00 : f32
    %27 = vector.broadcast %cst_16 : f32 to vector<1x8xf32>
    %28 = arith.subf %27, %26 : vector<1x8xf32>
    %29 = math.exp %28 : vector<1x8xf32>
    %30 = math.log1p %29 : vector<1x8xf32>
    %31 = arith.addf %20, %30 : vector<1x8xf32>
    %32 = arith.select %23, %25, %31 : vector<1x8xi1>, vector<1x8xf32>
    %cst_17 = arith.constant 0.000000e+00 : f32
    %33 = vector.broadcast %cst_17 : f32 to vector<1x8xf32>
    %34 = arith.subf %33, %32 : vector<1x8xf32>
    %cst_18 = arith.constant 0.000000e+00 : f32
    %35 = vector.broadcast %cst_18 : f32 to vector<1x8xf32>
    %36 = arith.maximumf %35, %15 : vector<1x8xf32>
    %37 = vector.broadcast %cst_18 : f32 to vector<1x8xf32>
    %38 = arith.subf %37, %15 : vector<1x8xf32>
    %39 = arith.cmpf one, %38, %38 : vector<1x8xf32>
    %40 = vector.broadcast %cst_18 : f32 to vector<1x8xf32>
    %41 = arith.addf %40, %15 : vector<1x8xf32>
    %42 = math.absf %38 : vector<1x8xf32>
    %cst_19 = arith.constant 0.000000e+00 : f32
    %43 = vector.broadcast %cst_19 : f32 to vector<1x8xf32>
    %44 = arith.subf %43, %42 : vector<1x8xf32>
    %45 = math.exp %44 : vector<1x8xf32>
    %46 = math.log1p %45 : vector<1x8xf32>
    %47 = arith.addf %36, %46 : vector<1x8xf32>
    %48 = arith.select %39, %41, %47 : vector<1x8xi1>, vector<1x8xf32>
    %cst_20 = arith.constant 0.000000e+00 : f32
    %49 = vector.broadcast %cst_20 : f32 to vector<1x8xf32>
    %50 = arith.subf %49, %48 : vector<1x8xf32>
    %cst_21 = arith.constant 2.000000e+00 : f32
    %51 = vector.broadcast %cst_21 : f32 to vector<1x8xf32>
    %52 = arith.mulf %51, %16 : vector<1x8xf32>
    %53 = arith.mulf %52, %34 : vector<1x8xf32>
    %cst_22 = arith.constant 1.000000e+00 : f32
    %54 = vector.broadcast %cst_22 : f32 to vector<1x8xf32>
    %55 = arith.subf %54, %16 : vector<1x8xf32>
    %56 = arith.mulf %55, %50 : vector<1x8xf32>
    %57 = arith.addf %53, %56 : vector<1x8xf32>
    %cst_23 = arith.constant 0.000000e+00 : f32
    %58 = vector.broadcast %cst_23 : f32 to vector<1x8xf32>
    %59 = arith.subf %58, %57 : vector<1x8xf32>
    %cst_24 = arith.constant dense<0.000000e+00> : vector<1xf32>
    %60 = vector.multi_reduction <add>, %59, %cst_24 [1] : vector<1x8xf32> to vector<1xf32>
    %61 = vector.shape_cast %60 : vector<1xf32> to vector<1x1xf32>
    %cst_25 = arith.constant 8.000000e+00 : f32
    %62 = vector.broadcast %cst_25 : f32 to vector<1x1xf32>
    %63 = arith.divf %61, %62 : vector<1x1xf32>
    %cst_26 = arith.constant 0.000000e+00 : f32
    %64 = vector.broadcast %cst_26 : f32 to vector<1x8xf32>
    %65 = arith.cmpf ogt, %15, %64 : vector<1x8xf32>
    %66 = arith.extui %65 : vector<1x8xi1> to vector<1x8xi32>
    %67 = arith.sitofp %66 : vector<1x8xi32> to vector<1x8xf32>
    %68 = arith.cmpf oeq, %67, %16 : vector<1x8xf32>
    %69 = arith.extui %68 : vector<1x8xi1> to vector<1x8xi32>
    %70 = arith.sitofp %69 : vector<1x8xi32> to vector<1x8xf32>
    %cst_27 = arith.constant dense<0.000000e+00> : vector<1xf32>
    %71 = vector.multi_reduction <add>, %70, %cst_27 [1] : vector<1x8xf32> to vector<1xf32>
    %72 = vector.shape_cast %71 : vector<1xf32> to vector<1x1xf32>
    %cst_28 = arith.constant 8.000000e+00 : f32
    %73 = vector.broadcast %cst_28 : f32 to vector<1x1xf32>
    %74 = arith.divf %72, %73 : vector<1x1xf32>
    %c0_29 = arith.constant 0 : index
    %c0_30 = arith.constant 0 : index
    %75 = vector.load %arg6[%c0_29, %c0_30] : memref<4x8xf32, #tpu.memory_space<vmem>>, vector<1x8xf32>
    tpu.vector_store %arg6[%c0_29, %c0_30], %15 {strides = array<i32>} : memref<4x8xf32, #tpu.memory_space<vmem>>, vector<1x8xf32>,
    %c1 = arith.constant 1 : index
    %c0_31 = arith.constant 0 : index
    %76 = vector.load %arg6[%c1, %c0_31] : memref<4x8xf32, #tpu.memory_space<vmem>>, vector<1x8xf32>
    tpu.vector_store %arg6[%c1, %c0_31], %67 {strides = array<i32>} : memref<4x8xf32, #tpu.memory_space<vmem>>, vector<1x8xf32>,
    %77 = vector.shape_cast %63 : vector<1x1xf32> to vector<1x1xf32>
    %78 = vector.broadcast %77 : vector<1x1xf32> to vector<1x8xf32>
    %c2 = arith.constant 2 : index
    %c0_32 = arith.constant 0 : index
    %79 = vector.load %arg6[%c2, %c0_32] : memref<4x8xf32, #tpu.memory_space<vmem>>, vector<1x8xf32>
    tpu.vector_store %arg6[%c2, %c0_32], %78 {strides = array<i32>} : memref<4x8xf32, #tpu.memory_space<vmem>>, vector<1x8xf32>,
    %80 = vector.shape_cast %74 : vector<1x1xf32> to vector<1x1xf32>
    %81 = vector.broadcast %80 : vector<1x1xf32> to vector<1x8xf32>
    %c3 = arith.constant 3 : index
    %c0_33 = arith.constant 0 : index
    %82 = vector.load %arg6[%c3, %c0_33] : memref<4x8xf32, #tpu.memory_space<vmem>>, vector<1x8xf32>
    tpu.vector_store %arg6[%c3, %c0_33], %81 {strides = array<i32>} : memref<4x8xf32, #tpu.memory_space<vmem>>, vector<1x8xf32>,
    return
  }
}

</mosaic_0001>

<bundles_post_ra>
// kernel: tpu_custom_call.1
= control target key start
LH: loop header
LB: loop body
LE: loop exit
PB: predicated region body
PF: predicated region fallthrough
CT: control target
= control target key end

     0   :  { %s3415_s0 = inlined_call_operand.vmem [shape: bf16[768,8], index: 0, kind: input, shape index: {}]   ;;  %s3416_s1 = inlined_call_operand.hbm [shape: bf16[256,768], index: 1, kind: input, shape index: {}]   ;;  %s3417_s2 = inlined_call_operand.vmem [shape: f32[256,1], index: 2, kind: input, shape index: {}]   ;;  %s3418_s3 = inlined_call_operand.vmem [shape: f32[1,256], index: 3, kind: input, shape index: {}]   ;;  %s3419_s4 = inlined_call_operand.<no memory space> [shape: f32[1,1], index: 4, kind: input, shape index: {}]   ;;  %s3420_s5 = inlined_call_operand.vmem [shape: f32[1,8], index: 5, kind: input, shape index: {}]   ;;  %s3421_s6 = inlined_call_operand.hbm [shape: f32[4,8], index: 6, kind: output, shape index: {}]  }
   0x1   :  { %v11_v0 = vstv %s3419_s4 }
   0x2   :  { %12 = vst [vmem:[#allocation2] sm:$0x1] %v11_v0 }
   0x3   :  { %13 = vsyncpa [#allocation4], 0 }
   0x4   :  { %14 = vsyncpa [#allocation5], 0  ;;  %s2731_s23 = smov [#allocation3]  }
   0x5   :  { %s22_s24 = sshll.u32 %s2731_s23, 4  ;;  %s23_s24 = int_to_ptr.vmem [resolvable:$true] %s22_s24 }
   0x6   :  { %s2695_s25 = scalar_lea.vmem %s23_s24, 12288  ;;  %p2700_p1 = scmp.lt.s32.totalorder %s23_s24, %s23_s24 }
   0x7   :  { %p2696_p0 = scmp.ne.s32.totalorder %s23_s24, %s2695_s25  ;;  %p2701_p2 = scmp.lt.s32.totalorder %s2695_s25, %s2695_s25 }
   0x9   :  { %p2702_p3 = por %p2701_p2, %p2700_p1 }
   0xb   :  { %p2703_p4 = pnand %p2702_p3, %p2696_p0 }
   0xd   :  { %2706 = shalt.err (!%p2703_p4)
}
   0xe   :  { %s2732_s26 = smov 384   ;;  %s2733_s27 = smov 24  }
   0xf   :  { %28 = dma.hbm_to_vmem [thread:$0]  %s3416_s1, 12288, %s23_s24, [#allocation4], %s2732_s26, %s2732_s26, %s2733_s27  }
  0x10   :  { %2727 = dma.done.wait [#allocation4], 12288  }
  0x11   :  { %2728 = vsyncadd [#allocation4], 4294955008  ;;  %v2734_v1 = vmov 0   ;;  %v2487_v2 = vld [vmem:[%s3415_s0 + $0x78] sm:$0xff]   ;;  %v2489_v4 = vld [vmem:[%s3415_s0 + $0x70] sm:$0xff]  }
  0x12   :  { %2486 = vset.pattern.permute.xlu1 %v2734_v1  ;;  %2485 = vset.pattern.permute.xlu0 %v2734_v1  ;;  %v2488_v3 = vld [vmem:[%s3415_s0 + $0x38] sm:$0xff]   ;;  %v2490_v5 = vld [vmem:[%s3415_s0 + $0x30] sm:$0xff]   ;;  %v2491_v6 = vld [vmem:[%s3415_s0 + $0x68] sm:$0xff]  }
  0x13   :  { %2092 = vmatprep.subr.bf16.mxu0 %v2487_v2  ;;  %2463 = vmatprep.subr.bf16.mxu1 %v2487_v2  ;;  %v2492_v7 = vld [vmem:[%s3415_s0 + $0x28] sm:$0xff]   ;;  %v2493_v8 = vld [vmem:[%s3415_s0 + $0x60] sm:$0xff]   ;;  %v2495_v10 = vld [vmem:[%s3415_s0 + $0x58] sm:$0xff]  }
  0x14   :  { %2093 = vmatpush3.bf16.msra.mxu0 %v2488_v3  ;;  %2471 = vmatpush3.bf16.msra.mxu1 %v2488_v3  ;;  %v2494_v9 = vld [vmem:[%s3415_s0 + $0x20] sm:$0xff]   ;;  %v2496_v11 = vld [vmem:[%s3415_s0 + $0x18] sm:$0xff]   ;;  %v2497_v12 = vld [vmem:[%s3415_s0 + $0x50] sm:$0xff]  }
  0x15   :  { %2094 = vmatprep.subr.bf16.mxu0 %v2489_v4  ;;  %2464 = vmatprep.subr.bf16.mxu1 %v2489_v4  ;;  %v2505_v13 = vld [vmem:[#allocation3 + $0x4] ss:$24 sps:$4 sm:$0xff]   ;;  %v2508_v14 = vld [vmem:[#allocation3 + $0x1b4] ss:$24 sps:$4 sm:$0xff]   ;;  %v2503_v23 = vld [vmem:[#allocation3] ss:$24 sps:$4 sm:$0xff]  }
  0x16   :  { %v2498_v15 = vld [vmem:[%s3415_s0 + $0x10] sm:$0xff]   ;;  %v2499_v16 = vld [vmem:[%s3415_s0 + $0x48] sm:$0xff]   ;;  %1225 = vmatprep.mubr.bf16.mxu0 %v2505_v13  ;;  %1297 = vmatprep.mubr.bf16.mxu1 %v2508_v14  ;;  %v2501_v19 = vld [vmem:[%s3415_s0 + $0x40] sm:$0xff]  }
  0x17   :  { %v263_v17 = vld [vmem:[%s3417_s2 + $0xf0] sm:$0xff]  ;;  %v2500_v18 = vld [vmem:[%s3415_s0 + $0x8] sm:$0xff]   ;;  %v2502_v21 = vld [vmem:[%s3415_s0] sm:$0xff]  }
  0x18   :  { %2095 = vmatpush3.bf16.msra.mxu0 %v2490_v5  ;;  %2472 = vmatpush3.bf16.msra.mxu1 %v2490_v5  ;;  %v247_v20 = vld [vmem:[%s3417_s2 + $0x70] sm:$0xff]  ;;  %v246_v22 = vld [vmem:[%s3417_s2 + $0x68] sm:$0xff]  ;;  %v2527_v25 = vld [vmem:[%s3415_s0 + $0xf8] sm:$0xff]  }
  0x19   :  { %2096 = vmatprep.subr.bf16.mxu0 %v2491_v6  ;;  %2465 = vmatprep.subr.bf16.mxu1 %v2491_v6  ;;  %v2506_v24 = vld [vmem:[#allocation3 + $0x1b0] ss:$24 sps:$4 sm:$0xff]   ;;  %v2509_v26 = vld [vmem:[#allocation3 + $0x34] ss:$24 sps:$4 sm:$0xff]   ;;  %v2511_v27 = vld [vmem:[#allocation3 + $0x1e4] ss:$24 sps:$4 sm:$0xff]  }
  0x1a   :  { %417 = vperm.xlu1 %2486, %v263_v17   ;;  %v245_v28 = vld [vmem:[%s3417_s2 + $0x60] sm:$0xff]  ;;  %v2528_v29 = vld [vmem:[%s3415_s0 + $0xb8] sm:$0xff]   ;;  %v2529_v30 = vld [vmem:[%s3415_s0 + $0xf0] sm:$0xff]  }
  0x1b   :  { %v244_v31 = vld [vmem:[%s3417_s2 + $0x58] sm:$0xff]  ;;  %v2513_v32 = vld [vmem:[#allocation3 + $0x30] ss:$24 sps:$4 sm:$0xff]   ;;  %v2539_v42 = vld [vmem:[%s3415_s0 + $0xe0] sm:$0xff]  }
  0x1c   :  { %2097 = vmatpush3.bf16.msra.mxu0 %v2492_v7  ;;  %2473 = vmatpush3.bf16.msra.mxu1 %v2492_v7  ;;  %v2514_v33 = vld [vmem:[#allocation3 + $0x1e0] ss:$24 sps:$4 sm:$0xff]   ;;  %v2530_v34 = vld [vmem:[%s3415_s0 + $0xb0] sm:$0xff]   ;;  %v2515_v36 = vld [vmem:[#allocation3 + $0x64] ss:$24 sps:$4 sm:$0xff]  }
  0x1d   :  { %2098 = vmatprep.subr.bf16.mxu0 %v2493_v8  ;;  %2466 = vmatprep.subr.bf16.mxu1 %v2493_v8  ;;  %v264_v35 = vld [vmem:[%s3417_s2 + $0xf8] sm:$0xff]  ;;  %v2537_v37 = vld [vmem:[%s3415_s0 + $0xe8] sm:$0xff]   ;;  %v243_v40 = vld [vmem:[%s3417_s2 + $0x50] sm:$0xff] }
  0x1e   :  { %337 = vperm.xlu1 %2486, %v247_v20   ;;  %422 = vperm.xlu0 %2485, %v264_v35   ;;  %v2517_v38 = vld [vmem:[#allocation3 + $0x214] ss:$24 sps:$4 sm:$0xff]   ;;  %v2540_v44 = vld [vmem:[%s3415_s0 + $0xa0] sm:$0xff]   ;;  %v2520_v46 = vld [vmem:[#allocation3 + $0x210] ss:$24 sps:$4 sm:$0xff]  }
  0x1f   :  { %v248_v39 = vld [vmem:[%s3417_s2 + $0x78] sm:$0xff]  ;;  %v2538_v41 = vld [vmem:[%s3415_s0 + $0xa8] sm:$0xff]   ;;  %v241_v52 = vld [vmem:[%s3417_s2 + $0x40] sm:$0xff] }
  0x20   :  { %2099 = vmatpush3.bf16.msra.mxu0 %v2494_v9  ;;  %2474 = vmatpush3.bf16.msra.mxu1 %v2494_v9  ;;  %v242_v43 = vld [vmem:[%s3417_s2 + $0x48] sm:$0xff]  ;;  %v2519_v45 = vld [vmem:[#allocation3 + $0x60] ss:$24 sps:$4 sm:$0xff]   ;;  %v2551_v55 = vld [vmem:[%s3415_s0 + $0xd0] sm:$0xff]  }
  0x21   :  { %2100 = vmatprep.subr.bf16.mxu0 %v2495_v10  ;;  %2467 = vmatprep.subr.bf16.mxu1 %v2495_v10  ;;  %v2548_v47 = vld [vmem:[%s3415_s0 + $0x178] sm:$0xff]   ;;  %v262_v50 = vld [vmem:[%s3417_s2 + $0xe8] sm:$0xff]  ;;  %v2552_v56 = vld [vmem:[%s3415_s0 + $0x170] sm:$0xff]  }
  0x22   :  { %332 = vperm.xlu1 %2486, %v246_v22   ;;  %342 = vperm.xlu0 %2485, %v248_v39   ;;  %v2521_v48 = vld [vmem:[#allocation3 + $0x94] ss:$24 sps:$4 sm:$0xff]   ;;  %v2523_v51 = vld [vmem:[#allocation3 + $0x244] ss:$24 sps:$4 sm:$0xff]   ;;  %v2525_v59 = vld [vmem:[#allocation3 + $0x90] ss:$24 sps:$4 sm:$0xff]  }
  0x23   :  { %v2547_v49 = vld [vmem:[%s3415_s0 + $0xd8] sm:$0xff]   ;;  %v261_v57 = vld [vmem:[%s3417_s2 + $0xe0] sm:$0xff]  ;;  %v2553_v58 = vld [vmem:[%s3415_s0 + $0x90] sm:$0xff]  }
  0x24   :  { %2101 = vmatpush3.bf16.msra.mxu0 %v2496_v11  ;;  %2475 = vmatpush3.bf16.msra.mxu1 %v2496_v11  ;;  %v2550_v53 = vld [vmem:[%s3415_s0 + $0x138] sm:$0xff]   ;;  %v2554_v60 = vld [vmem:[%s3415_s0 + $0x130] sm:$0xff]   ;;  %v2561_v1 = vld [vmem:[%s3415_s0 + $0xc8] sm:$0xff]  }
  0x25   :  { %2102 = vmatprep.subr.bf16.mxu0 %v2497_v12  ;;  %2468 = vmatprep.subr.bf16.mxu1 %v2497_v12  ;;  %v2549_v54 = vld [vmem:[%s3415_s0 + $0x98] sm:$0xff]   ;;  %v2562_v2 = vld [vmem:[%s3415_s0 + $0x168] sm:$0xff]   ;;  %v239_v4 = vld [vmem:[%s3417_s2 + $0x30] sm:$0xff] }
  0x26   :  { %327 = vperm.xlu1 %2486, %v245_v28   ;;  %412 = vperm.xlu0 %2485, %v262_v50   ;;  %v240_v61 = vld [vmem:[%s3417_s2 + $0x38] sm:$0xff]  ;;  %v2563_v5 = vld [vmem:[%s3415_s0 + $0x88] sm:$0xff]   ;;  %v2565_v9 = vld [vmem:[%s3415_s0 + $0xc0] sm:$0xff]  }
  0x27   :  { %v2526_v62 = vld [vmem:[#allocation3 + $0x240] ss:$24 sps:$4 sm:$0xff]   ;;  %v2531_v63 = vld [vmem:[#allocation3 + $0xc4] ss:$24 sps:$4 sm:$0xff]   ;;  %v2533_v0 = vld [vmem:[#allocation3 + $0x274] ss:$24 sps:$4 sm:$0xff]  }
  0x28   :  { %2103 = vmatpush3.bf16.msra.mxu0 %v2498_v15  ;;  %2476 = vmatpush3.bf16.msra.mxu1 %v2498_v15  ;;  %v260_v3 = vld [vmem:[%s3417_s2 + $0xd8] sm:$0xff]  ;;  %v2564_v6 = vld [vmem:[%s3415_s0 + $0x128] sm:$0xff]   ;;  %v2566_v12 = vld [vmem:[%s3415_s0 + $0x160] sm:$0xff]  }
  0x29   :  { %2104 = vmatprep.subr.bf16.mxu0 %v2499_v16  ;;  %2469 = vmatprep.subr.bf16.mxu1 %v2499_v16  ;;  %v2535_v7 = vld [vmem:[#allocation3 + $0xc0] ss:$24 sps:$4 sm:$0xff]   ;;  %v2536_v8 = vld [vmem:[#allocation3 + $0x270] ss:$24 sps:$4 sm:$0xff]   ;;  %v2541_v10 = vld [vmem:[#allocation3 + $0xf4] ss:$24 sps:$4 sm:$0xff]  }
  0x2a   :  { %322 = vperm.xlu1 %2486, %v244_v31   ;;  %407 = vperm.xlu0 %2485, %v261_v57   ;;  %v2543_v11 = vld [vmem:[#allocation3 + $0x2a4] ss:$24 sps:$4 sm:$0xff]   ;;  %v259_v13 = vld [vmem:[%s3417_s2 + $0xd0] sm:$0xff] }
  0x2b   :  { %v238_v14 = vld [vmem:[%s3417_s2 + $0x28] sm:$0xff]  ;;  %v2567_v15 = vld [vmem:[%s3415_s0 + $0x80] sm:$0xff]   ;;  %v2575_v17 = vld [vmem:[%s3415_s0 + $0x158] sm:$0xff]  }
  0x2c   :  { %2105 = vmatpush3.bf16.msra.mxu0 %v2500_v18  ;;  %2477 = vmatpush3.bf16.msra.mxu1 %v2500_v18  ;;  %v2568_v16 = vld [vmem:[%s3415_s0 + $0x120] sm:$0xff]   ;;  %v2545_v18 = vld [vmem:[#allocation3 + $0xf0] ss:$24 sps:$4 sm:$0xff]   ;;  %v236_v28 = vld [vmem:[%s3417_s2 + $0x18] sm:$0xff] }
  0x2d   :  { %2106 = vmatprep.subr.bf16.mxu0 %v2501_v19  ;;  %2470 = vmatprep.subr.bf16.mxu1 %v2501_v19  ;;  %v2546_v19 = vld [vmem:[#allocation3 + $0x2a0] ss:$24 sps:$4 sm:$0xff]   ;;  %v258_v20 = vld [vmem:[%s3417_s2 + $0xc8] sm:$0xff] }
  0x2e   :  { %317 = vperm.xlu1 %2486, %v243_v40   ;;  %402 = vperm.xlu0 %2485, %v260_v3   ;;  %v2555_v22 = vld [vmem:[#allocation3 + $0x124] ss:$24 sps:$4 sm:$0xff]   ;;  %v2560_v31 = vld [vmem:[#allocation3 + $0x2d0] ss:$24 sps:$4 sm:$0xff]  }
  0x2f   :  { %v2586_v35 = vld [vmem:[%s3415_s0 + $0x108] sm:$0xff]   ;;  %v2588_v39 = vld [vmem:[%s3415_s0 + $0x100] sm:$0xff]   ;;  %v2584_v50 = vld [vmem:[#allocation3 + $0x38] ss:$24 sps:$4 sm:$0xff]  }
  0x30   :  { %2107 = vmatpush3.bf16.msra.mxu0 %v2502_v21  ;;  %2478 = vmatpush3.bf16.msra.mxu1 %v2502_v21  ;;  %v237_v21 = vld [vmem:[%s3417_s2 + $0x20] sm:$0xff]  ;;  %v234_v40 = vld [vmem:[%s3417_s2 + $0x8] sm:$0xff] }
  0x31   :  { %2204 = vmatprep.subr.bf16.mxu1 %v2527_v25  ;;  %2316 = vmatprep.subr.bf16.mxu0 %v2548_v47  ;;  %v257_v25 = vld [vmem:[%s3417_s2 + $0xc0] sm:$0xff] }
  0x32   :  { %312 = vperm.xlu1 %2486, %v242_v43   ;;  %397 = vperm.xlu0 %2485, %v259_v13   ;;  %v233_v43 = vld [vmem:[%s3417_s2] sm:$0xff]  ;;  %v2623_v13 = vld [vmem:[#allocation3 + $0x158] ss:$24 sps:$4 sm:$0xff]  }
  0x33   :  { %1226 = vmatmul.mubr.bf16.vlgmr.msra.gmra.mxu0 %v2503_v23  ;;  %1298 = vmatmul.mubr.bf16.vlgmr.msra.gmra.mxu1 %v2506_v24  ;;  %v2576_v23 = vld [vmem:[%s3415_s0 + $0x118] sm:$0xff]   ;;  %v2577_v24 = vld [vmem:[%s3415_s0 + $0x150] sm:$0xff]  }
  0x34   :  { %1233 = vmatprep.mubr.bf16.mxu0 %v2509_v26  ;;  %1305 = vmatprep.mubr.bf16.mxu1 %v2511_v27  ;;  %v2557_v26 = vld [vmem:[#allocation3 + $0x2d4] ss:$24 sps:$4 sm:$0xff]   ;;  %v2597_v57 = vld [vmem:[#allocation3 + $0x44] ss:$24 sps:$4 sm:$0xff]  }
  0x35   :  { %2205 = vmatpush3.bf16.msra.mxu1 %v2528_v29  ;;  %2317 = vmatpush3.bf16.msra.mxu0 %v2550_v53  ;;  %v2578_v27 = vld [vmem:[%s3415_s0 + $0x110] sm:$0xff]   ;;  %v2585_v29 = vld [vmem:[%s3415_s0 + $0x148] sm:$0xff]  }
  0x36   :  { %2206 = vmatprep.subr.bf16.mxu1 %v2529_v30  ;;  %307 = vperm.xlu1 %2486, %v241_v52   ;;  %v2559_v30 = vld [vmem:[#allocation3 + $0x120] ss:$24 sps:$4 sm:$0xff]   ;;  %v2581_v47 = vld [vmem:[#allocation3 + $0x3c] ss:$24 sps:$4 sm:$0xff]  }
  0x37   :  { %2318 = vmatprep.subr.bf16.mxu0 %v2552_v56  ;;  %392 = vperm.xlu0 %2485, %v258_v20   ;;  %v251_v52 = vld [vmem:[%s3417_s2 + $0x90] sm:$0xff]  ;;  %v2609_v3 = vld [vmem:[#allocation3 + $0xa4] ss:$24 sps:$4 sm:$0xff]  }
  0x38   :  { %v2593_v53 = vld [vmem:[#allocation3 + $0x14] ss:$24 sps:$4 sm:$0xff]   ;;  %v2633_v20 = vld [vmem:[#allocation3 + $0x164] ss:$24 sps:$4 sm:$0xff]  }
  0x39   :  { %2207 = vmatpush3.bf16.msra.mxu1 %v2530_v34  ;;  %2319 = vmatpush3.bf16.msra.mxu0 %v2554_v60  ;;  %v2569_v34 = vld [vmem:[#allocation3 + $0x154] ss:$24 sps:$4 sm:$0xff]   ;;  %v2599_v60 = vld [vmem:[#allocation3 + $0x98] ss:$24 sps:$4 sm:$0xff]  }
  0x3a   :  { %2208 = vmatprep.subr.bf16.mxu1 %v2537_v37  ;;  %302 = vperm.xlu1 %2486, %v240_v61   ;;  %v255_v37 = vld [vmem:[%s3417_s2 + $0xb0] sm:$0xff]  ;;  %v2600_v61 = vld [vmem:[#allocation3 + $0x40] ss:$24 sps:$4 sm:$0xff]  }
  0x3b   :  { %1234 = vmatmul.mubr.bf16.gmra.mxu0 %v2513_v32  ;;  %1306 = vmatmul.mubr.bf16.gmra.mxu1 %v2514_v33  ;;  %v256_v32 = vld [vmem:[%s3417_s2 + $0xb8] sm:$0xff]  ;;  %v235_v33 = vld [vmem:[%s3417_s2 + $0x10] sm:$0xff] }
  0x3c   :  { %1241 = vmatprep.mubr.bf16.mxu0 %v2515_v36  ;;  %1313 = vmatprep.mubr.bf16.mxu1 %v2517_v38  ;;  %v2587_v36 = vld [vmem:[%s3415_s0 + $0x140] sm:$0xff]  }
  0x3d   :  { %2209 = vmatpush3.bf16.msra.mxu1 %v2538_v41  ;;  %2320 = vmatprep.subr.bf16.mxu0 %v2562_v2  ;;  %v2573_v38 = vld [vmem:[#allocation3 + $0xc] ss:$24 sps:$4 sm:$0xff]   ;;  %v2595_v56 = vld [vmem:[#allocation3 + $0x9c] ss:$24 sps:$4 sm:$0xff]  }
  0x3e   :  { %2210 = vmatprep.subr.bf16.mxu1 %v2539_v42  ;;  %297 = vperm.xlu1 %2486, %v239_v4   ;;  %v254_v41 = vld [vmem:[%s3417_s2 + $0xa8] sm:$0xff]  ;;  %v2607_v2 = vld [vmem:[#allocation3 + $0xfc] ss:$24 sps:$4 sm:$0xff]   ;;  %v2611_v4 = vld [vmem:[#allocation3 + $0xf8] ss:$24 sps:$4 sm:$0xff]  }
  0x3f   :  { %2321 = vmatpush3.bf16.msra.mxu0 %v2564_v6  ;;  %387 = vperm.xlu0 %2485, %v257_v25   ;;  %v2571_v42 = vld [vmem:[#allocation3 + $0x8] ss:$24 sps:$4 sm:$0xff]   ;;  %v2613_v6 = vld [vmem:[#allocation3 + $0x12c] ss:$24 sps:$4 sm:$0xff]  }
  0x40   :  { %2322 = vmatprep.subr.bf16.mxu0 %v2566_v12  ;;  %v1773_v12 = vld [vmem:[#allocation2] sm:$0x1]  ;;  %v2641_v25 = vld [vmem:[#allocation3 + $0x1e8] ss:$24 sps:$4 sm:$0xff]  }
  0x41   :  { %2211 = vmatpush3.bf16.msra.mxu1 %v2540_v44  ;;  %v2574_v44 = vld [vmem:[#allocation3 + $0x150] ss:$24 sps:$4 sm:$0xff]  }
  0x42   :  { %2212 = vmatprep.subr.bf16.mxu1 %v2547_v49  ;;  %292 = vperm.xlu1 %2486, %v238_v14   ;;  %v2583_v49 = vld [vmem:[#allocation3 + $0x180] ss:$24 sps:$4 sm:$0xff]  }
  0x43   :  { %1242 = vmatmul.mubr.bf16.gmra.mxu0 %v2519_v45  ;;  %1314 = vmatmul.mubr.bf16.gmra.mxu1 %v2520_v46  ;;  %v2579_v45 = vld [vmem:[#allocation3 + $0x184] ss:$24 sps:$4 sm:$0xff]   ;;  %v2624_v14 = vld [vmem:[#allocation3 + $0x100] ss:$24 sps:$4 sm:$0xff]  }
  0x44   :  { %1249 = vmatprep.mubr.bf16.mxu0 %v2521_v48  ;;  %1321 = vmatprep.mubr.bf16.mxu1 %v2523_v51  ;;  %v253_v46 = vld [vmem:[%s3417_s2 + $0xa0] sm:$0xff]  ;;  %v252_v48 = vld [vmem:[%s3417_s2 + $0x98] sm:$0xff] }
  0x45   :  { %2213 = vmatpush3.bf16.msra.mxu1 %v2549_v54  ;;  %2323 = vmatpush3.bf16.msra.mxu0 %v2568_v16  ;;  %v2589_v51 = vld [vmem:[#allocation3 + $0x6c] ss:$24 sps:$4 sm:$0xff]   ;;  %v2591_v54 = vld [vmem:[#allocation3 + $0x10] ss:$24 sps:$4 sm:$0xff]  }
  0x46   :  { %2214 = vmatprep.subr.bf16.mxu1 %v2551_v55  ;;  %2324 = vmatprep.subr.bf16.mxu0 %v2575_v17  ;;  %v2594_v55 = vld [vmem:[#allocation3 + $0x68] ss:$24 sps:$4 sm:$0xff]   ;;  %v2627_v16 = vld [vmem:[#allocation3 + $0x134] ss:$24 sps:$4 sm:$0xff]  }
  0x47   :  { %287 = vperm.xlu1 %2486, %v237_v21   ;;  %382 = vperm.xlu0 %2485, %v256_v32   ;;  %v2629_v17 = vld [vmem:[#allocation3 + $0x188] ss:$24 sps:$4 sm:$0xff]   ;;  %v2635_v21 = vld [vmem:[#allocation3 + $0x1b8] ss:$24 sps:$4 sm:$0xff]   ;;  %v2651_v32 = vld [vmem:[#allocation3 + $0x1f4] ss:$24 sps:$4 sm:$0xff]  }
  0x49   :  { %2215 = vmatpush3.bf16.msra.mxu1 %v2553_v58  ;;  %2325 = vmatpush3.bf16.msra.mxu0 %v2576_v23  ;;  %v250_v58 = vld [vmem:[%s3417_s2 + $0x88] sm:$0xff] }
  0x4a   :  { %2216 = vmatprep.subr.bf16.mxu1 %v2561_v1  ;;  %2326 = vmatprep.subr.bf16.mxu0 %v2577_v24  ;;  %v2606_v1 = vld [vmem:[#allocation3 + $0x70] ss:$24 sps:$4 sm:$0xff]   ;;  %v2637_v23 = vld [vmem:[#allocation3 + $0x1ec] ss:$24 sps:$4 sm:$0xff]  }
  0x4b   :  { %1250 = vmatmul.mubr.bf16.gmra.mxu0 %v2525_v59  ;;  %1322 = vmatmul.mubr.bf16.gmra.mxu1 %v2526_v62  ;;  %v249_v59 = vld [vmem:[%s3417_s2 + $0x80] sm:$0xff]  ;;  %v2639_v24 = vld [vmem:[#allocation3 + $0x194] ss:$24 sps:$4 sm:$0xff]  }
  0x4c   :  { %1257 = vmatprep.mubr.bf16.mxu0 %v2531_v63  ;;  %1329 = vmatprep.mubr.bf16.mxu1 %v2533_v0  ;;  %v2601_v62 = vld [vmem:[#allocation3 + $0xcc] ss:$24 sps:$4 sm:$0xff]   ;;  %v2605_v0 = vld [vmem:[#allocation3 + $0xc8] ss:$24 sps:$4 sm:$0xff]  }
  0x4d   :  { %2217 = vmatpush3.bf16.msra.mxu1 %v2563_v5  ;;  %282 = vperm.xlu1 %2486, %v236_v28   ;;  %v2603_v63 = vld [vmem:[#allocation3 + $0x74] ss:$24 sps:$4 sm:$0xff]   ;;  %v2612_v5 = vld [vmem:[#allocation3 + $0xa0] ss:$24 sps:$4 sm:$0xff]   ;;  %v2645_v28 = vld [vmem:[#allocation3 + $0x1c4] ss:$24 sps:$4 sm:$0xff]  }
  0x4e   :  { %2218 = vmatprep.subr.bf16.mxu1 %v2565_v9  ;;  %2327 = vmatpush3.bf16.msra.mxu0 %v2578_v27  ;;  %v2618_v9 = vld [vmem:[#allocation3 + $0xd0] ss:$24 sps:$4 sm:$0xff]   ;;  %v2643_v27 = vld [vmem:[#allocation3 + $0x21c] ss:$24 sps:$4 sm:$0xff]  }
  0x4f   :  { %2328 = vmatprep.subr.bf16.mxu0 %v2585_v29  ;;  %377 = vperm.xlu0 %2485, %v255_v37   ;;  %v2647_v29 = vld [vmem:[#allocation3 + $0x218] ss:$24 sps:$4 sm:$0xff]  }
  0x50   :  { %v2659_v37 = vld [vmem:[#allocation3 + $0x278] ss:$24 sps:$4 sm:$0xff]  }
  0x51   :  { %2219 = vmatpush3.bf16.msra.mxu1 %v2567_v15  ;;  %277 = vperm.xlu1 %2486, %v235_v33   ;;  %v2625_v15 = vld [vmem:[#allocation3 + $0x18c] ss:$24 sps:$4 sm:$0xff]   ;;  %v2653_v33 = vld [vmem:[#allocation3 + $0x248] ss:$24 sps:$4 sm:$0xff]  }
  0x52   :  { %2329 = vmatpush3.bf16.msra.mxu0 %v2586_v35  ;;  %v2655_v35 = vld [vmem:[#allocation3 + $0x27c] ss:$24 sps:$4 sm:$0xff]  }
  0x53   :  { %1258 = vmatmul.mubr.bf16.gmra.mxu0 %v2535_v7  ;;  %1330 = vmatmul.mubr.bf16.gmra.mxu1 %v2536_v8  ;;  %v2615_v7 = vld [vmem:[#allocation3 + $0xd4] ss:$24 sps:$4 sm:$0xff]   ;;  %v2617_v8 = vld [vmem:[#allocation3 + $0x128] ss:$24 sps:$4 sm:$0xff]  }
  0x54   :  { %1265 = vmatprep.mubr.bf16.mxu0 %v2541_v10  ;;  %1337 = vmatprep.mubr.bf16.mxu1 %v2543_v11  ;;  %v2619_v10 = vld [vmem:[#allocation3 + $0x15c] ss:$24 sps:$4 sm:$0xff]  }
  0x55   :  { %2330 = vmatprep.subr.bf16.mxu0 %v2587_v36  ;;  %272 = vperm.xlu1 %2486, %v234_v40   ;;  %v2621_v11 = vld [vmem:[#allocation3 + $0x104] ss:$24 sps:$4 sm:$0xff]  }
  0x56   :  { %2331 = vmatpush3.bf16.msra.mxu0 %v2588_v39  ;;  %372 = vperm.xlu0 %2485, %v254_v41   ;;  %v2657_v36 = vld [vmem:[#allocation3 + $0x224] ss:$24 sps:$4 sm:$0xff]   ;;  %v2663_v41 = vld [vmem:[#allocation3 + $0x254] ss:$24 sps:$4 sm:$0xff]  }
  0x57   :  { %v2661_v40 = vld [vmem:[#allocation3 + $0x2ac] ss:$24 sps:$4 sm:$0xff]  }
  0x59   :  { %267 = vperm.xlu1 %2486, %v233_v43   ;;  %v2665_v43 = vld [vmem:[#allocation3 + $0x2a8] ss:$24 sps:$4 sm:$0xff]  }
  0x5a   :  { %367 = vperm.xlu0 %2485, %v253_v46   ;;  %v2669_v46 = vld [vmem:[#allocation3 + $0x284] ss:$24 sps:$4 sm:$0xff]  }
  0x5b   :  { %1266 = vmatmul.mubr.bf16.gmra.mxu0 %v2545_v18  ;;  %1338 = vmatmul.mubr.bf16.gmra.mxu1 %v2546_v19  ;;  %v2630_v18 = vld [vmem:[#allocation3 + $0x130] ss:$24 sps:$4 sm:$0xff]   ;;  %v2631_v19 = vld [vmem:[#allocation3 + $0x1bc] ss:$24 sps:$4 sm:$0xff]  }
  0x5c   :  { %1273 = vmatprep.mubr.bf16.mxu0 %v2555_v22  ;;  %1345 = vmatprep.mubr.bf16.mxu1 %v2557_v26  ;;  %v2636_v22 = vld [vmem:[#allocation3 + $0x160] ss:$24 sps:$4 sm:$0xff]   ;;  %v2642_v26 = vld [vmem:[#allocation3 + $0x190] ss:$24 sps:$4 sm:$0xff]  }
  0x5e   :  { %362 = vperm.xlu0 %2485, %v252_v48   ;;  %v2671_v48 = vld [vmem:[#allocation3 + $0x2d8] ss:$24 sps:$4 sm:$0xff]  }
  0x62   :  { %357 = vperm.xlu0 %2485, %v251_v52   ;;  %v2675_v52 = vld [vmem:[#allocation3 + $0x2b0] ss:$24 sps:$4 sm:$0xff]  }
  0x63   :  { %1274 = vmatmul.mubr.bf16.gmra.mxu0 %v2559_v30  ;;  %1346 = vmatmul.mubr.bf16.gmra.mxu1 %v2560_v31  ;;  %v2648_v30 = vld [vmem:[#allocation3 + $0x1c0] ss:$24 sps:$4 sm:$0xff]   ;;  %v2649_v31 = vld [vmem:[#allocation3 + $0x24c] ss:$24 sps:$4 sm:$0xff]  }
  0x64   :  { %1281 = vmatprep.mubr.bf16.mxu0 %v2569_v34  ;;  %1386 = vmatprep.mubr.bf16.mxu1 %v2573_v38  ;;  %v2654_v34 = vld [vmem:[#allocation3 + $0x1f0] ss:$24 sps:$4 sm:$0xff]   ;;  %v2660_v38 = vld [vmem:[#allocation3 + $0x220] ss:$24 sps:$4 sm:$0xff]  }
  0x66   :  { %352 = vperm.xlu0 %2485, %v250_v58  }
  0x6a   :  { %347 = vperm.xlu0 %2485, %v249_v59  }
  0x6b   :  { %1282 = vmatmul.mubr.bf16.gmra.mxu0 %v2574_v44  ;;  %1387 = vmatmul.mubr.bf16.vlgmr.msra.gmra.mxu1 %v2571_v42  ;;  %v2666_v44 = vld [vmem:[#allocation3 + $0x250] ss:$24 sps:$4 sm:$0xff]  }
  0x6c   :  { %1289 = vmatprep.mubr.bf16.mxu0 %v2579_v45  ;;  %1394 = vmatprep.mubr.bf16.mxu1 %v2581_v47  ;;  %v2667_v45 = vld [vmem:[#allocation3 + $0x2dc] ss:$24 sps:$4 sm:$0xff]  }
  0x6e   :  { %1776 = vperm.xlu0 %2485, %v1773_v12  }
  0x73   :  { %1290 = vmatmul.mubr.bf16.gmra.mxu0 %v2583_v49  ;;  %1395 = vmatmul.mubr.bf16.gmra.mxu1 %v2584_v50  ;;  %v2672_v49 = vld [vmem:[#allocation3 + $0x280] ss:$24 sps:$4 sm:$0xff]   ;;  %v2673_v50 = vld [vmem:[#allocation3 + $0x2b4] ss:$24 sps:$4 sm:$0xff]  }
  0x74   :  { %1402 = vmatprep.mubr.bf16.mxu1 %v2589_v51  ;;  %1547 = vmatprep.mubr.bf16.mxu0 %v2593_v53 }
  0x7b   :  { %1403 = vmatmul.mubr.bf16.gmra.mxu1 %v2594_v55  ;;  %1548 = vmatmul.mubr.bf16.vlgmr.msra.gmra.mxu0 %v2591_v54  ;;  %v2676_v54 = vld [vmem:[#allocation3 + $0x2e4] ss:$24 sps:$4 sm:$0xff]  }
  0x7c   :  { %1410 = vmatprep.mubr.bf16.mxu1 %v2595_v56  ;;  %1555 = vmatprep.mubr.bf16.mxu0 %v2597_v57  ;;  %v2678_v56 = vld [vmem:[#allocation3 + $0x2e0] ss:$24 sps:$4 sm:$0xff]  }
  0x83   :  { %1411 = vmatmul.mubr.bf16.gmra.mxu1 %v2599_v60  ;;  %1556 = vmatmul.mubr.bf16.gmra.mxu0 %v2600_v61 }
  0x84   :  { %1418 = vmatprep.mubr.bf16.mxu1 %v2601_v62  ;;  %1563 = vmatprep.mubr.bf16.mxu0 %v2603_v63 }
  0x8b   :  { %1419 = vmatmul.mubr.bf16.gmra.mxu1 %v2605_v0  ;;  %1564 = vmatmul.mubr.bf16.gmra.mxu0 %v2606_v1 }
  0x8c   :  { %1426 = vmatprep.mubr.bf16.mxu1 %v2607_v2  ;;  %1571 = vmatprep.mubr.bf16.mxu0 %v2609_v3 }
  0x93   :  { %1427 = vmatmul.mubr.bf16.gmra.mxu1 %v2611_v4  ;;  %1572 = vmatmul.mubr.bf16.gmra.mxu0 %v2612_v5 }
  0x94   :  { %1434 = vmatprep.mubr.bf16.mxu1 %v2613_v6  ;;  %1579 = vmatprep.mubr.bf16.mxu0 %v2615_v7 }
  0x95   :  { %v3018_v39 = vpop.permute.xlu1 %417 }
  0x96   :  { %3439 = vst [vmem:[#allocation9_spill] sm:$0xff] %v3018_v39 }
  0x99   :  { %v3020_v42 = vpop.permute.xlu1 %337 }
  0x9b   :  { %1435 = vmatmul.mubr.bf16.gmra.mxu1 %v2617_v8  ;;  %1580 = vmatmul.mubr.bf16.gmra.mxu0 %v2618_v9 }
  0x9c   :  { %1442 = vmatprep.mubr.bf16.mxu1 %v2619_v10  ;;  %1587 = vmatprep.mubr.bf16.mxu0 %v2621_v11 }
  0x9d   :  { %v3022_v47 = vpop.permute.xlu1 %332 }
  0xa1   :  { %v3024_v51 = vpop.permute.xlu1 %327 }
  0xa3   :  { %1443 = vmatmul.mubr.bf16.gmra.mxu1 %v2623_v13  ;;  %1588 = vmatmul.mubr.bf16.gmra.mxu0 %v2624_v14 }
  0xa4   :  { %1450 = vmatprep.mubr.bf16.mxu1 %v2625_v15  ;;  %1595 = vmatprep.mubr.bf16.mxu0 %v2627_v16 }
  0xa5   :  { %v3026_v53 = vpop.permute.xlu1 %322 }
  0xa9   :  { %v3028_v55 = vpop.permute.xlu1 %317 }
  0xab   :  { %1451 = vmatmul.mubr.bf16.gmra.mxu1 %v2629_v17  ;;  %1596 = vmatmul.mubr.bf16.gmra.mxu0 %v2630_v18 }
  0xac   :  { %1458 = vmatprep.mubr.bf16.mxu1 %v2631_v19  ;;  %1603 = vmatprep.mubr.bf16.mxu0 %v2633_v20 }
  0xad   :  { %v3030_v59 = vpop.permute.xlu1 %312 }
  0xb1   :  { %v3036_v4 = vpop.permute.xlu1 %307 }
  0xb3   :  { %1459 = vmatmul.mubr.bf16.gmra.mxu1 %v2635_v21  ;;  %1604 = vmatmul.mubr.bf16.gmra.mxu0 %v2636_v22 }
  0xb4   :  { %1466 = vmatprep.mubr.bf16.mxu1 %v2637_v23  ;;  %1611 = vmatprep.mubr.bf16.mxu0 %v2639_v24 }
  0xb5   :  { %v3046_v15 = vpop.permute.xlu1 %302 }
  0xb9   :  { %v3052_v24 = vpop.permute.xlu1 %297 }
  0xbb   :  { %1467 = vmatmul.mubr.bf16.gmra.mxu1 %v2641_v25  ;;  %1612 = vmatmul.mubr.bf16.gmra.mxu0 %v2642_v26 }
  0xbc   :  { %1474 = vmatprep.mubr.bf16.mxu1 %v2643_v27  ;;  %1619 = vmatprep.mubr.bf16.mxu0 %v2645_v28 }
  0xc3   :  { %1475 = vmatmul.mubr.bf16.gmra.mxu1 %v2647_v29  ;;  %1620 = vmatmul.mubr.bf16.gmra.mxu0 %v2648_v30 }
  0xc4   :  { %1482 = vmatprep.mubr.bf16.mxu1 %v2649_v31  ;;  %1627 = vmatprep.mubr.bf16.mxu0 %v2651_v32 }
  0xcb   :  { %1483 = vmatmul.mubr.bf16.gmra.mxu1 %v2653_v33  ;;  %1628 = vmatmul.mubr.bf16.gmra.mxu0 %v2654_v34 }
  0xcc   :  { %1490 = vmatprep.mubr.bf16.mxu1 %v2655_v35  ;;  %1635 = vmatprep.mubr.bf16.mxu0 %v2657_v36  ;;  %v3062_v35 = vpop.permute.xlu1 %292 }
  0xd3   :  { %1491 = vmatmul.mubr.bf16.gmra.mxu1 %v2659_v37  ;;  %1636 = vmatmul.mubr.bf16.gmra.mxu0 %v2660_v38 }
  0xd4   :  { %1498 = vmatprep.mubr.bf16.mxu1 %v2661_v40  ;;  %1643 = vmatprep.mubr.bf16.mxu0 %v2663_v41 }
  0xdb   :  { %1499 = vmatmul.mubr.bf16.gmra.mxu1 %v2665_v43  ;;  %1644 = vmatmul.mubr.bf16.gmra.mxu0 %v2666_v44 }
  0xdc   :  { %1506 = vmatprep.mubr.bf16.mxu1 %v2667_v45  ;;  %1651 = vmatprep.mubr.bf16.mxu0 %v2669_v46  ;;  %v3068_v46 = vpop.permute.xlu0 %422 }
  0xdd   :  { %3440 = vst [vmem:[#allocation10_spill] sm:$0xff] %v3068_v46 }
  0xe3   :  { %1507 = vmatmul.mubr.bf16.gmra.mxu1 %v2671_v48  ;;  %1652 = vmatmul.mubr.bf16.gmra.mxu0 %v2672_v49  ;;  %v3070_v48 = vpop.permute.xlu1 %287 }
  0xe4   :  { %1659 = vmatprep.mubr.bf16.mxu0 %v2673_v50 }
  0xeb   :  { %1660 = vmatmul.mubr.bf16.gmra.mxu0 %v2675_v52 }
  0xec   :  { %1667 = vmatprep.mubr.bf16.mxu0 %v2676_v54 }
  0xf3   :  { %v2108_v57 = vpop.f32.mrf.mxu0  ;;  %v2162_v58 = vpop.f32.mrf.mxu1  ;;  %1668 = vmatmul.mubr.bf16.gmra.mxu0 %v2678_v56 }
  0xf5   :  { %v2109_v60 = vpop.f32.mrf.mxu0  ;;  %v2163_v61 = vpop.f32.mrf.mxu1 }
  0xf6   :  { %v3032_v62 = vadd.f32 %v2109_v60, %v2108_v57  ;;  %v3034_v63 = vadd.f32 %v2163_v61, %v2162_v58 }
  0xf7   :  { %v2111_v0 = vpop.f32.mrf.mxu0  ;;  %v2165_v1 = vpop.f32.mrf.mxu1 }
  0xf9   :  { %v2112_v2 = vpop.f32.mrf.mxu0  ;;  %v2166_v3 = vpop.f32.mrf.mxu1 }
  0xfa   :  { %v3038_v5 = vadd.f32 %v2112_v2, %v2111_v0  ;;  %v3040_v6 = vadd.f32 %v2166_v3, %v2165_v1  ;;  %v3080_v1 = vpop.permute.xlu0 %342  ;;  %v3082_v2 = vpop.permute.xlu1 %282 }
  0xfb   :  { %v2114_v7 = vpop.f32.mrf.mxu0  ;;  %v2168_v8 = vpop.f32.mrf.mxu1 }
  0xfd   :  { %v2115_v9 = vpop.f32.mrf.mxu0  ;;  %v2169_v10 = vpop.f32.mrf.mxu1 }
  0xfe   :  { %v3042_v11 = vadd.f32 %v2115_v9, %v2114_v7  ;;  %v3044_v12 = vadd.f32 %v2169_v10, %v2168_v8 }
  0xff   :  { %v2117_v13 = vpop.f32.mrf.mxu0  ;;  %v2171_v14 = vpop.f32.mrf.mxu1 }
 0x101   :  { %v2118_v16 = vpop.f32.mrf.mxu0  ;;  %v2172_v17 = vpop.f32.mrf.mxu1 }
 0x102   :  { %v3048_v18 = vadd.f32 %v2118_v16, %v2117_v13  ;;  %v3050_v19 = vadd.f32 %v2172_v17, %v2171_v14  ;;  %v3088_v17 = vpop.permute.xlu0 %412 }
 0x103   :  { %v2120_v20 = vpop.f32.mrf.mxu0  ;;  %v2174_v21 = vpop.f32.mrf.mxu1  ;;  %3441 = vst [vmem:[#allocation11_spill] sm:$0xff] %v3088_v17 }
 0x105   :  { %v2121_v22 = vpop.f32.mrf.mxu0  ;;  %v2175_v23 = vpop.f32.mrf.mxu1 }
 0x106   :  { %v3054_v25 = vadd.f32 %v2121_v22, %v2120_v20  ;;  %v3056_v26 = vadd.f32 %v2175_v23, %v2174_v21  ;;  %v278_v20 = vpop.permute.xlu1 %277 }
 0x107   :  { %v2123_v27 = vpop.f32.mrf.mxu0  ;;  %v2177_v28 = vpop.f32.mrf.mxu1 }
 0x109   :  { %v2124_v29 = vpop.f32.mrf.mxu0  ;;  %v2178_v30 = vpop.f32.mrf.mxu1 }
 0x10a   :  { %v3058_v31 = vadd.f32 %v2124_v29, %v2123_v27  ;;  %v3060_v32 = vadd.f32 %v2178_v30, %v2177_v28 }
 0x10b   :  { %v2126_v33 = vpop.f32.mrf.mxu0  ;;  %v2180_v34 = vpop.f32.mrf.mxu1 }
 0x10d   :  { %v2127_v36 = vpop.f32.mrf.mxu0  ;;  %v2181_v37 = vpop.f32.mrf.mxu1 }
 0x10e   :  { %v3064_v38 = vadd.f32 %v2127_v36, %v2126_v33  ;;  %v3066_v40 = vadd.f32 %v2181_v37, %v2180_v34  ;;  %v3098_v37 = vpop.permute.xlu0 %407 }
 0x10f   :  { %v2129_v41 = vpop.f32.mrf.mxu0  ;;  %v2183_v43 = vpop.f32.mrf.mxu1  ;;  %3444 = vst [vmem:[#allocation14_spill] sm:$0xff] %v3098_v37 }
 0x111   :  { %v2130_v44 = vpop.f32.mrf.mxu0  ;;  %v2184_v45 = vpop.f32.mrf.mxu1 }
 0x112   :  { %v3072_v49 = vadd.f32 %v2130_v44, %v2129_v41  ;;  %v3074_v50 = vadd.f32 %v2184_v45, %v2183_v43  ;;  %v273_v41 = vpop.permute.xlu1 %272 }
 0x113   :  { %v2132_v52 = vpop.f32.mrf.mxu0  ;;  %v2186_v54 = vpop.f32.mrf.mxu1 }
 0x115   :  { %v2133_v56 = vpop.f32.mrf.mxu0  ;;  %v2187_v57 = vpop.f32.mrf.mxu1 }
 0x116   :  { %v3076_v58 = vadd.f32 %v2133_v56, %v2132_v52  ;;  %v3078_v60 = vadd.f32 %v2187_v57, %v2186_v54 }
 0x117   :  { %v2135_v61 = vpop.f32.mrf.mxu0  ;;  %v2189_v0 = vpop.f32.mrf.mxu1 }
 0x119   :  { %v2136_v3 = vpop.f32.mrf.mxu0  ;;  %v2190_v7 = vpop.f32.mrf.mxu1 }
 0x11a   :  { %v3084_v8 = vadd.f32 %v2136_v3, %v2135_v61  ;;  %v3086_v9 = vadd.f32 %v2190_v7, %v2189_v0  ;;  %v3104_v0 = vpop.permute.xlu0 %402  ;;  %v268_v3 = vpop.permute.xlu1 %267 }
 0x11b   :  { %v2138_v10 = vpop.f32.mrf.mxu0  ;;  %v2192_v13 = vpop.f32.mrf.mxu1 }
 0x11d   :  { %v2139_v14 = vpop.f32.mrf.mxu0  ;;  %v2193_v16 = vpop.f32.mrf.mxu1 }
 0x11e   :  { %v3090_v21 = vadd.f32 %v2139_v14, %v2138_v10  ;;  %v3092_v22 = vadd.f32 %v2193_v16, %v2192_v13 }
 0x11f   :  { %v2141_v23 = vpop.f32.mrf.mxu0  ;;  %v2195_v27 = vpop.f32.mrf.mxu1 }
 0x120   :  { %3442 = vst [vmem:[#allocation12_spill] sm:$0xff] %v3092_v22 }
 0x121   :  { %v2142_v28 = vpop.f32.mrf.mxu0  ;;  %v2196_v29 = vpop.f32.mrf.mxu1 }
 0x122   :  { %v3094_v30 = vadd.f32 %v2142_v28, %v2141_v23  ;;  %v3096_v33 = vadd.f32 %v2196_v29, %v2195_v27  ;;  %v1228_v27 = vadd.f32 %v3032_v62, %v268_v3 }
 0x123   :  { %v2144_v34 = vpop.f32.mrf.mxu0  ;;  %v2198_v36 = vpop.f32.mrf.mxu1 }
 0x124   :  { %3443 = vst [vmem:[#allocation13_spill] sm:$0xff] %v3096_v33 }
 0x125   :  { %v2145_v43 = vpop.f32.mrf.mxu0  ;;  %v2199_v44 = vpop.f32.mrf.mxu1 }
 0x126   :  { %v3100_v45 = vadd.f32 %v2145_v43, %v2144_v34  ;;  %v3102_v52 = vadd.f32 %v2199_v44, %v2198_v36  ;;  %v3113_v43 = vpop.permute.xlu0 %397 }
 0x127   :  { %v2147_v54 = vpop.f32.mrf.mxu0  ;;  %v2201_v56 = vpop.f32.mrf.mxu1 }
 0x128   :  { %3445 = vst [vmem:[#allocation15_spill] sm:$0xff] %v3102_v52 }
 0x129   :  { %v2148_v57 = vpop.f32.mrf.mxu0  ;;  %v2202_v61 = vpop.f32.mrf.mxu1 }
 0x12a   :  { %v3106_v7 = vadd.f32 %v2148_v57, %v2147_v54  ;;  %v3108_v10 = vadd.f32 %v2202_v61, %v2201_v56  ;;  %v1231_v54 = vadd.f32 %v3038_v5, %v273_v41  ;;  %v3118_v3 = vpop.permute.xlu0 %392 }
 0x12b   :  { %v2150_v13 = vpop.f32.mrf.mxu0  ;;  %v2220_v14 = vpop.f32.mrf.mxu1 }
 0x12c   :  { %3446 = vst [vmem:[#allocation16_spill] sm:$0xff] %v3108_v10 }
 0x12d   :  { %v2151_v16 = vpop.f32.mrf.mxu0  ;;  %v2221_v23 = vpop.f32.mrf.mxu1 }
 0x12e   :  { %v3111_v28 = vadd.f32 %v2151_v16, %v2150_v13  ;;  %v2222_v29 = vadd.f32 %v2221_v23, %v2220_v14  ;;  %v1236_v13 = vadd.f32 %v3042_v11, %v278_v20 }
 0x12f   :  { %v2153_v34 = vpop.f32.mrf.mxu0  ;;  %v2223_v36 = vpop.f32.mrf.mxu1 }
 0x130   :  { %v1389_v44 = vadd.f32 %v2222_v29, %v1228_v27 }
 0x131   :  { %v2154_v46 = vpop.f32.mrf.mxu0  ;;  %v2224_v33 = vpop.f32.mrf.mxu1 }
 0x132   :  { %v3116_v56 = vadd.f32 %v2154_v46, %v2153_v34  ;;  %v2225_v57 = vadd.f32 %v2224_v33, %v2223_v36  ;;  %v1239_v46 = vadd.f32 %v3048_v18, %v3082_v2 }
 0x133   :  { %v2156_v61 = vpop.f32.mrf.mxu0  ;;  %v2226_v10 = vpop.f32.mrf.mxu1 }
 0x134   :  { %v1392_v17 = vadd.f32 %v2225_v57, %v1231_v54  ;;  %v3127_v54 = vpop.permute.xlu0 %387 }
 0x135   :  { %v2157_v22 = vpop.f32.mrf.mxu0  ;;  %v2227_v62 = vpop.f32.mrf.mxu1 }
 0x136   :  { %v3121_v14 = vadd.f32 %v2157_v22, %v2156_v61  ;;  %v2228_v16 = vadd.f32 %v2227_v62, %v2226_v10  ;;  %v1244_v22 = vadd.f32 %v3054_v25, %v3070_v48 }
 0x137   :  { %v2159_v23 = vpop.f32.mrf.mxu0  ;;  %v2229_v27 = vpop.f32.mrf.mxu1 }
 0x138   :  { %v1397_v29 = vadd.f32 %v2228_v16, %v1236_v13 }
 0x139   :  { %v2160_v37 = vpop.f32.mrf.mxu0  ;;  %v2230_v5 = vpop.f32.mrf.mxu1 }
 0x13a   :  { %v3125_v33 = vadd.f32 %v2160_v37, %v2159_v23  ;;  %v2231_v41 = vadd.f32 %v2230_v5, %v2229_v27  ;;  %v3133_v37 = vpop.permute.xlu0 %382  ;;  %v1247_v23 = vadd.f32 %v3058_v31, %v3062_v35 }
 0x13b   :  { %v2232_v34 = vpop.f32.mrf.mxu1  ;;  %v2332_v36 = vpop.f32.mrf.mxu0 }
 0x13c   :  { %v1400_v57 = vadd.f32 %v2231_v41, %v1239_v46 }
 0x13d   :  { %v2233_v11 = vpop.f32.mrf.mxu1  ;;  %v2333_v20 = vpop.f32.mrf.mxu0 }
 0x13e   :  { %v2234_v10 = vadd.f32 %v2233_v11, %v2232_v34  ;;  %v2334_v61 = vadd.f32 %v2333_v20, %v2332_v36 }
 0x13f   :  { %v2235_v62 = vpop.f32.mrf.mxu1  ;;  %v2335_v13 = vpop.f32.mrf.mxu0 }
 0x140   :  { %v1405_v16 = vadd.f32 %v2234_v10, %v1244_v22  ;;  %v3131_v52 = vadd.f32 %v2334_v61, %v1389_v44  ;;  %v1252_v44 = vadd.f32 %v3064_v38, %v3052_v24  ;;  %v3141_v10 = vpop.permute.xlu0 %377 }
 0x141   :  { %v2236_v18 = vpop.f32.mrf.mxu1  ;;  %v2336_v2 = vpop.f32.mrf.mxu0 }
 0x142   :  { %3447 = vst [vmem:[#allocation17_spill] sm:$0xff] %v3131_v52  ;;  %v2237_v27 = vadd.f32 %v2236_v18, %v2235_v62  ;;  %v2337_v5 = vadd.f32 %v2336_v2, %v2335_v13 }
 0x143   :  { %v2238_v46 = vpop.f32.mrf.mxu1  ;;  %v2338_v41 = vpop.f32.mrf.mxu0 }
 0x144   :  { %v1408_v39 = vadd.f32 %v2237_v27, %v1247_v23  ;;  %v3137_v25 = vadd.f32 %v2337_v5, %v1392_v17  ;;  %v1255_v17 = vadd.f32 %v3072_v49, %v3046_v15 }
 0x145   :  { %v2239_v48 = vpop.f32.mrf.mxu1  ;;  %v2339_v34 = vpop.f32.mrf.mxu0 }
 0x146   :  { %3448 = vst [vmem:[#allocation18_spill] sm:$0xff] %v3137_v25  ;;  %v2240_v36 = vadd.f32 %v2239_v48, %v2238_v46  ;;  %v2340_v11 = vadd.f32 %v2339_v34, %v2338_v41  ;;  %v3149_v46 = vpop.permute.xlu0 %372 }
 0x147   :  { %v2241_v20 = vpop.f32.mrf.mxu1  ;;  %v2341_v22 = vpop.f32.mrf.mxu0 }
 0x148   :  { %v1413_v61 = vadd.f32 %v2240_v36, %v1252_v44  ;;  %v3143_v31 = vadd.f32 %v2340_v11, %v1397_v29  ;;  %v1260_v29 = vadd.f32 %v3076_v58, %v3036_v4 }
 0x149   :  { %v2242_v35 = vpop.f32.mrf.mxu1  ;;  %v2342_v62 = vpop.f32.mrf.mxu0 }
 0x14a   :  { %3449 = vst [vmem:[#allocation19_spill] sm:$0xff] %v3143_v31  ;;  %v2243_v13 = vadd.f32 %v2242_v35, %v2241_v20  ;;  %v2343_v18 = vadd.f32 %v2342_v62, %v2341_v22 }
 0x14b   :  { %v2244_v2 = vpop.f32.mrf.mxu1  ;;  %v2344_v23 = vpop.f32.mrf.mxu0 }
 0x14c   :  { %v1416_v27 = vadd.f32 %v2243_v13, %v1255_v17  ;;  %v3147_v24 = vadd.f32 %v2343_v18, %v1400_v57  ;;  %v1263_v57 = vadd.f32 %v3084_v8, %v3030_v59  ;;  %v3157_v17 = vpop.permute.xlu0 %367 }
 0x14d   :  { %v2245_v38 = vpop.f32.mrf.mxu1  ;;  %v2345_v5 = vpop.f32.mrf.mxu0 }
 0x14e   :  { %3450 = vst [vmem:[#allocation20_spill] sm:$0xff] %v3147_v24  ;;  %v2246_v41 = vadd.f32 %v2245_v38, %v2244_v2  ;;  %v2346_v48 = vadd.f32 %v2345_v5, %v2344_v23  ;;  %v1779_v38 = vlaneseq }
 0x14f   :  { %v2247_v34 = vpop.f32.mrf.mxu1  ;;  %v2347_v44 = vpop.f32.mrf.mxu0 }
 0x150   :  { %v1421_v36 = vadd.f32 %v2246_v41, %v1260_v29  ;;  %v3153_v15 = vadd.f32 %v2346_v48, %v1405_v16  ;;  %v1268_v16 = vadd.f32 %v3090_v21, %v3028_v55 }
 0x151   :  { %v2248_v49 = vpop.f32.mrf.mxu1  ;;  %v2348_v11 = vpop.f32.mrf.mxu0 }
 0x152   :  { %3451 = vst [vmem:[#allocation21_spill] sm:$0xff] %v3153_v15  ;;  %v2249_v20 = vadd.f32 %v2248_v49, %v2247_v34  ;;  %v2349_v22 = vadd.f32 %v2348_v11, %v2347_v44  ;;  %v3165_v34 = vpop.permute.xlu0 %362  ;;  %v3169_v11 = vshrl.u32 %v1779_v38, 7 }
 0x153   :  { %v2250_v35 = vpop.f32.mrf.mxu1  ;;  %v2350_v62 = vpop.f32.mrf.mxu0 }
 0x154   :  { %v1424_v13 = vadd.f32 %v2249_v20, %v1263_v57  ;;  %v3159_v4 = vadd.f32 %v2349_v22, %v1408_v39  ;;  %v1271_v39 = vadd.f32 %v3094_v30, %v3026_v53  ;;  %3454 = vst [vmem:[#allocation24_spill] sm:$0xff] %v3169_v11  ;;  %v1790_v22 = vsub.s32 1, %v3169_v11 }
 0x155   :  { %v2251_v58 = vpop.f32.mrf.mxu1  ;;  %v2351_v18 = vpop.f32.mrf.mxu0  ;;  %v1276_v53 = vadd.f32 %v3100_v45, %v3024_v51 }
 0x156   :  { %3452 = vst [vmem:[#allocation22_spill] sm:$0xff] %v3159_v4  ;;  %v2252_v2 = vadd.f32 %v2251_v58, %v2250_v35  ;;  %v2352_v23 = vadd.f32 %v2351_v18, %v2350_v62 }
 0x157   :  { %v2253_v5 = vpop.f32.mrf.mxu1  ;;  %v2353_v29 = vpop.f32.mrf.mxu0 }
 0x158   :  { %v1429_v59 = vadd.f32 %v2252_v2, %v1268_v16  ;;  %v3163_v8 = vadd.f32 %v2352_v23, %v1413_v61  ;;  %v3176_v61 = vld [vmem:[%s3418_s3] sm:$0x3] }
 0x159   :  { %v2254_v41 = vpop.f32.mrf.mxu1  ;;  %v2354_v48 = vpop.f32.mrf.mxu0  ;;  %3456 = vst [vmem:[#allocation26_spill] sm:$0xff] %v3176_v61  ;;  %v1791_v2 = vrot.slane %v3176_v61, %v1790_v22 }
 0x15a   :  { %3453 = vst [vmem:[#allocation23_spill] sm:$0xff] %v3163_v8  ;;  %v2255_v44 = vadd.f32 %v2254_v41, %v2253_v5  ;;  %v2355_v49 = vadd.f32 %v2354_v48, %v2353_v29  ;;  %v1279_v41 = vadd.f32 %v3106_v7, %v3022_v47 }
 0x15b   :  { %v2256_v55 = vpop.f32.mrf.mxu1  ;;  %v2356_v21 = vpop.f32.mrf.mxu0  ;;  %1858 = vmatprep.mubr.f32.mxu1 %v1791_v2 }
 0x15c   :  { %v1432_v57 = vadd.f32 %v2255_v44, %v1271_v39  ;;  %v3171_v20 = vadd.f32 %v2355_v49, %v1416_v27  ;;  %v358_v27 = vpop.permute.xlu0 %357 }
 0x15d   :  { %v2257_v35 = vpop.f32.mrf.mxu1  ;;  %v2357_v62 = vpop.f32.mrf.mxu0 }
 0x15e   :  { %3455 = vst [vmem:[#allocation25_spill] sm:$0xff] %v3171_v20  ;;  %v2258_v30 = vadd.f32 %v2257_v35, %v2256_v55  ;;  %v2358_v58 = vadd.f32 %v2357_v62, %v2356_v21  ;;  %v3263_v20 = vadd.f32 %v3050_v19, %v3149_v46  ;;  %v1332_v19 = vadd.f32 %v3078_v60, %v3113_v43 }
 0x15f   :  { %v2259_v18 = vpop.f32.mrf.mxu1  ;;  %v2359_v16 = vpop.f32.mrf.mxu0 }
 0x160   :  { %v1437_v23 = vadd.f32 %v2258_v30, %v1276_v53  ;;  %v3182_v38 = vadd.f32 %v2358_v58, %v1421_v36  ;;  %v353_v45 = vpop.permute.xlu0 %352  ;;  %v1284_v36 = vadd.f32 %v3111_v28, %v3020_v42  ;;  %3470 = vst [vmem:[#allocation40_spill] sm:$0xff] %v3263_v20 }
 0x161   :  { %v2260_v5 = vpop.f32.mrf.mxu1  ;;  %v2360_v29 = vpop.f32.mrf.mxu0 }
 0x162   :  { %3457 = vst [vmem:[#allocation27_spill] sm:$0xff] %v3182_v38  ;;  %v2261_v48 = vadd.f32 %v2260_v5, %v2259_v18  ;;  %v2361_v39 = vadd.f32 %v2360_v29, %v2359_v16  ;;  %v1287_v18 = vadd.f32 %v3116_v56, %v3080_v1  ;;  %v3267_v38 = vadd.f32 %v3056_v26, %v3141_v10  ;;  %v3473_v10 = vld [vmem:[#allocation9_spill] sm:$0xff] }
 0x163   :  { %v2262_v44 = vpop.f32.mrf.mxu1  ;;  %v2362_v51 = vpop.f32.mrf.mxu0  ;;  %v1335_v26 = vadd.f32 %v3086_v9, %v3104_v0 }
 0x164   :  { %v1440_v49 = vadd.f32 %v2261_v48, %v1279_v41  ;;  %v3186_v55 = vadd.f32 %v2361_v39, %v1424_v13  ;;  %v348_v16 = vpop.permute.xlu0 %347  ;;  %3471 = vst [vmem:[#allocation41_spill] sm:$0xff] %v3267_v38  ;;  %v3474_v38 = vld [vmem:[#allocation15_spill] sm:$0xff] }
 0x165   :  { %v2263_v21 = vpop.f32.mrf.mxu1  ;;  %v2363_v22 = vpop.f32.mrf.mxu0 }
 0x166   :  { %3458 = vst [vmem:[#allocation28_spill] sm:$0xff] %v3186_v55  ;;  %v2264_v35 = vadd.f32 %v2263_v21, %v2262_v44  ;;  %v2364_v62 = vadd.f32 %v2363_v22, %v2362_v51  ;;  %v1292_v44 = vadd.f32 %v3121_v14, %v348_v16  ;;  %v1300_v16 = vadd.f32 %v3034_v63, %v358_v27 }
 0x167   :  { %v2265_v53 = vpop.f32.mrf.mxu1  ;;  %v2365_v30 = vpop.f32.mrf.mxu0  ;;  %v3271_v55 = vadd.f32 %v3060_v32, %v3133_v37  ;;  %v1348_v32 = vadd.f32 %v3474_v38, %v3473_v10 }
 0x168   :  { %v1445_v58 = vadd.f32 %v2264_v35, %v1284_v36  ;;  %v3190_v2 = vadd.f32 %v2364_v62, %v1429_v59  ;;  %v1295_v62 = vadd.f32 %v3125_v33, %v353_v45  ;;  %v1303_v45 = vadd.f32 %v3040_v6, %v3165_v34 }
 0x169   :  { %v2266_v47 = vpop.f32.mrf.mxu1  ;;  %v2366_v7 = vpop.f32.mrf.mxu0  ;;  %3472 = vst [vmem:[#allocation42_spill] sm:$0xff] %v3271_v55  ;;  %v3478_v55 = vld [vmem:[#allocation13_spill] sm:$0xff] }
 0x16a   :  { %v2267_v13 = vadd.f32 %v2266_v47, %v2265_v53  ;;  %v2367_v5 = vadd.f32 %v2366_v7, %v2365_v30  ;;  %v3292_v60 = vmul.f32 0.01, %v3190_v2  ;;  %vm1686_vm11 = vcmp.ge.f32.partialorder %v3190_v2, 0.0 }
 0x16b   :  { %v2268_v29 = vpop.f32.mrf.mxu1  ;;  %v2368_v41 = vpop.f32.mrf.mxu0 }
 0x16c   :  { %v1448_v48 = vadd.f32 %v2267_v13, %v1287_v18  ;;  %v3194_v39 = vadd.f32 %v2367_v5, %v1432_v57 }
 0x16d   :  { %v2269_v42 = vpop.f32.mrf.mxu1  ;;  %v2369_v28 = vpop.f32.mrf.mxu0 }
 0x16e   :  { %v2270_v51 = vadd.f32 %v2269_v42, %v2268_v29  ;;  %v2370_v59 = vadd.f32 %v2369_v28, %v2368_v41  ;;  %v3295_v9 = vmul.f32 0.01, %v3194_v39  ;;  %vm1687_vm4 = vcmp.ge.f32.partialorder %v3194_v39, 0.0 }
 0x16f   :  { %v2271_v21 = vpop.f32.mrf.mxu1  ;;  %v2371_v22 = vpop.f32.mrf.mxu0 }
 0x170   :  { %v1453_v36 = vadd.f32 %v2270_v51, %v1292_v44  ;;  %v3197_v35 = vadd.f32 %v2370_v59, %v1437_v23 }
 0x171   :  { %v2272_v1 = vpop.f32.mrf.mxu1  ;;  %v2372_v56 = vpop.f32.mrf.mxu0 }
 0x172   :  { %v2273_v53 = vadd.f32 %v2272_v1, %v2271_v21  ;;  %v2373_v30 = vadd.f32 %v2372_v56, %v2371_v22  ;;  %v1308_v56 = vadd.f32 %v3044_v12, %v3157_v17  ;;  %vm1688_vm1 = vcmp.ge.f32.partialorder %v3197_v35, 0.0 }
 0x173   :  { %v2274_v47 = vpop.f32.mrf.mxu1  ;;  %v2374_v57 = vpop.f32.mrf.mxu0 }
 0x174   :  { %v1456_v7 = vadd.f32 %v2273_v53, %v1295_v62  ;;  %v3200_v18 = vadd.f32 %v2373_v30, %v1440_v49 }
 0x175   :  { %v2275_v13 = vpop.f32.mrf.mxu1  ;;  %v2375_v14 = vpop.f32.mrf.mxu0 }
 0x176   :  { %v2276_v5 = vadd.f32 %v2275_v13, %v2274_v47  ;;  %v2376_v29 = vadd.f32 %v2375_v14, %v2374_v57  ;;  %vm1689_vm0 = vcmp.ge.f32.partialorder %v3200_v18, 0.0 }
 0x177   :  { %v2277_v41 = vpop.f32.mrf.mxu1  ;;  %v2377_v23 = vpop.f32.mrf.mxu0 }
 0x178   :  { %v1461_v42 = vadd.f32 %v2276_v5, %v1300_v16  ;;  %v3203_v28 = vadd.f32 %v2376_v29, %v1445_v58 }
 0x179   :  { %v2278_v44 = vpop.f32.mrf.mxu1  ;;  %v2378_v33 = vpop.f32.mrf.mxu0 }
 0x17a   :  { %v2279_v51 = vadd.f32 %v2278_v44, %v2277_v41  ;;  %v2379_v59 = vadd.f32 %v2378_v33, %v2377_v23  ;;  %vm1690_vm6 = vcmp.ge.f32.partialorder %v3203_v28, 0.0 }
 0x17b   :  { %v2280_v49 = vpop.f32.mrf.mxu1  ;;  %v2380_v21 = vpop.f32.mrf.mxu0 }
 0x17c   :  { %v1464_v22 = vadd.f32 %v2279_v51, %v1303_v45  ;;  %v3207_v1 = vadd.f32 %v2379_v59, %v1448_v48 }
 0x17d   :  { %v2281_v63 = vpop.f32.mrf.mxu1  ;;  %v2381_v27 = vpop.f32.mrf.mxu0 }
 0x17e   :  { %v2282_v62 = vadd.f32 %v2281_v63, %v2280_v49  ;;  %v2382_v58 = vadd.f32 %v2381_v27, %v2380_v21  ;;  %vm1691_vm2 = vcmp.ge.f32.partialorder %v3207_v1, 0.0 }
 0x17f   :  { %v3211_v53 = vpop.f32.mrf.mxu1  ;;  %v2383_v30 = vpop.f32.mrf.mxu0 }
 0x180   :  { %3459 = vst [vmem:[#allocation29_spill] sm:$0xff] %v3211_v53  ;;  %v1469_v47 = vadd.f32 %v2282_v62, %v1308_v56  ;;  %v3213_v57 = vadd.f32 %v2382_v58, %v1453_v36 }
 0x181   :  { %v3215_v6 = vpop.f32.mrf.mxu1  ;;  %v2384_v34 = vpop.f32.mrf.mxu0 }
 0x182   :  { %3460 = vst [vmem:[#allocation30_spill] sm:$0xff] %v3213_v57  ;;  %3461 = vst [vmem:[#allocation31_spill] sm:$0xff] %v3215_v6  ;;  %v2385_v13 = vadd.f32 %v2384_v34, %v2383_v30 }
 0x183   :  { %v3217_v14 = vpop.f32.mrf.mxu1  ;;  %v2386_v48 = vpop.f32.mrf.mxu0 }
 0x184   :  { %v3219_v16 = vadd.f32 %v2385_v13, %v1456_v7 }
 0x185   :  { %v3221_v5 = vpop.f32.mrf.mxu1  ;;  %v2387_v12 = vpop.f32.mrf.mxu0 }
 0x186   :  { %3462 = vst [vmem:[#allocation32_spill] sm:$0xff] %v3219_v16  ;;  %v2388_v17 = vadd.f32 %v2387_v12, %v2386_v48 }
 0x187   :  { %v3223_v29 = vpop.f32.mrf.mxu1  ;;  %v2389_v41 = vpop.f32.mrf.mxu0 }
 0x188   :  { %v3225_v23 = vadd.f32 %v2388_v17, %v1461_v42 }
 0x189   :  { %v3227_v36 = vpop.f32.mrf.mxu1  ;;  %v2390_v44 = vpop.f32.mrf.mxu0 }
 0x18a   :  { %3463 = vst [vmem:[#allocation33_spill] sm:$0xff] %v3225_v23  ;;  %v2391_v33 = vadd.f32 %v2390_v44, %v2389_v41 }
 0x18b   :  { %v3229_v45 = vpop.f32.mrf.mxu1  ;;  %v2392_v51 = vpop.f32.mrf.mxu0 }
 0x18c   :  { %v3231_v59 = vadd.f32 %v2391_v33, %v1464_v22 }
 0x18d   :  { %v3233_v7 = vpop.f32.mrf.mxu1  ;;  %v2393_v49 = vpop.f32.mrf.mxu0 }
 0x18e   :  { %3464 = vst [vmem:[#allocation34_spill] sm:$0xff] %v3231_v59  ;;  %v2394_v21 = vadd.f32 %v2393_v49, %v2392_v51 }
 0x18f   :  { %v3235_v63 = vpop.f32.mrf.mxu1  ;;  %v3237_v27 = vpop.f32.mrf.mxu0 }
 0x190   :  { %3465 = vst [vmem:[#allocation35_spill] sm:$0xff] %v3237_v27  ;;  %v3239_v56 = vadd.f32 %v2394_v21, %v1469_v47  ;;  %v3275_v27 = vadd.f32 %v3066_v40, %v3127_v54  ;;  %v3477_v54 = vld [vmem:[#allocation11_spill] sm:$0xff] }
 0x191   :  { %v3241_v42 = vpop.f32.mrf.mxu1  ;;  %v3243_v62 = vpop.f32.mrf.mxu0  ;;  %v1343_v6 = vadd.f32 %v3478_v55, %v3477_v54  ;;  %v1722_v54 = vmul.f32 0.01, %v3203_v28 }
 0x192   :  { %3466 = vst [vmem:[#allocation36_spill] sm:$0xff] %v3239_v56  ;;  %3467 = vst [vmem:[#allocation37_spill] sm:$0xff] %v3243_v62 }
 0x193   :  { %v2298_v58 = vpop.f32.mrf.mxu1  ;;  %v3245_v30 = vpop.f32.mrf.mxu0 }
 0x194   :  { %3468 = vst [vmem:[#allocation38_spill] sm:$0xff] %v3245_v30  ;;  %v3476_v30 = vld [vmem:[#allocation12_spill] sm:$0xff] }
 0x195   :  { %v2299_v34 = vpop.f32.mrf.mxu1  ;;  %v3247_v22 = vpop.f32.mrf.mxu0 }
 0x196   :  { %3469 = vst [vmem:[#allocation39_spill] sm:$0xff] %v3247_v22  ;;  %v1327_v22 = vadd.f32 %v3074_v50, %v3118_v3  ;;  %v3479_v50 = vld [vmem:[#allocation10_spill] sm:$0xff]  ;;  %v3480_v3 = vld [vmem:[#allocation16_spill] sm:$0xff] }
 0x197   :  { %v2301_v13 = vpop.f32.mrf.mxu1  ;;  %v3249_v48 = vpop.f32.mrf.mxu0  ;;  %v1351_v53 = vadd.f32 %v3480_v3, %v3479_v50  ;;  %v1723_v50 = vmul.f32 0.01, %v3207_v1  ;;  %v2300_v3 = vadd.f32 %v2299_v34, %v2298_v58  ;;  %v2291_v58 = vadd.f32 %v3227_v36, %v3223_v29 }
 0x198   :  { %v1754_v29 = vsel %vm1690_vm6, %v3203_v28, %v1722_v54 }
 0x199   :  { %v2302_v12 = vpop.f32.mrf.mxu1  ;;  %v3251_v17 = vpop.f32.mrf.mxu0 }
 0x19a   :  { %v2303_v38 = vadd.f32 %v2302_v12, %v2301_v13 }
 0x19b   :  { %v2304_v41 = vpop.f32.mrf.mxu1  ;;  %v3253_v44 = vpop.f32.mrf.mxu0  ;;  %v3484_v28 = vld [vmem:[#allocation38_spill] sm:$0xff] }
 0x19d   :  { %v2305_v47 = vpop.f32.mrf.mxu1  ;;  %v3255_v33 = vpop.f32.mrf.mxu0 }
 0x19e   :  { %v2306_v0 = vadd.f32 %v2305_v47, %v2304_v41  ;;  %v1755_v47 = vsel %vm1691_vm2, %v3207_v1, %v1723_v50  ;;  %v2403_v1 = vadd.f32 %v3251_v17, %v3249_v48 }
 0x19f   :  { %v2307_v51 = vpop.f32.mrf.mxu1  ;;  %v3257_v49 = vpop.f32.mrf.mxu0 }
 0x1a1   :  { %v3259_v21 = vpop.f32.mrf.mxu0  ;;  %v2308_v61 = vpop.f32.mrf.mxu1 }
 0x1a2   :  { %v2309_v46 = vadd.f32 %v2308_v61, %v2307_v51 }
 0x1a3   :  { %v2410_v11 = vpop.f32.mrf.mxu0  ;;  %v2310_v57 = vpop.f32.mrf.mxu1 }
 0x1a4   :  { %v1504_v55 = vadd.f32 %v2309_v46, %v1343_v6  ;;  %v2297_v6 = vadd.f32 %v3241_v42, %v3235_v63  ;;  %v2409_v63 = vadd.f32 %v3259_v21, %v3257_v49  ;;  %v2288_v21 = vadd.f32 %v3221_v5, %v3217_v14 }
 0x1a5   :  { %v2411_v52 = vpop.f32.mrf.mxu0  ;;  %v2311_v31 = vpop.f32.mrf.mxu1 }
 0x1a6   :  { %v2312_v62 = vadd.f32 %v2311_v31, %v2310_v57  ;;  %v3475_v57 = vld [vmem:[#allocation14_spill] sm:$0xff]  ;;  %v1488_v34 = vadd.f32 %v2297_v6, %v1327_v22 }
 0x1a7   :  { %v2413_v25 = vpop.f32.mrf.mxu0  ;;  %v2313_v59 = vpop.f32.mrf.mxu1  ;;  %v1340_v40 = vadd.f32 %v3476_v30, %v3475_v57 }
 0x1a8   :  { %v1509_v61 = vadd.f32 %v2312_v62, %v1348_v32  ;;  %v1649_v36 = vadd.f32 %v2409_v63, %v1488_v34  ;;  %v3496_v34 = vld [vmem:[#allocation21_spill] sm:$0xff] }
 0x1a9   :  { %v2414_v16 = vpop.f32.mrf.mxu0  ;;  %v2314_v4 = vpop.f32.mrf.mxu1 }
 0x1aa   :  { %v2315_v37 = vadd.f32 %v2314_v4, %v2313_v59  ;;  %vm1701_vm12 = vcmp.ge.f32.partialorder %v1649_v36, 0.0 }
 0x1ab   :  { %v2416_v23 = vpop.f32.mrf.mxu0 }
 0x1ac   :  { %v1512_v30 = vadd.f32 %v2315_v37, %v1351_v53  ;;  %v1496_v53 = vadd.f32 %v2303_v38, %v1335_v26  ;;  %v3482_v26 = vld [vmem:[#allocation31_spill] sm:$0xff]  ;;  %v3483_v37 = vld [vmem:[#allocation42_spill] sm:$0xff] }
 0x1ad   :  { %v2417_v24 = vpop.f32.mrf.mxu0  ;;  %v1480_v14 = vadd.f32 %v2291_v58, %v3483_v37  ;;  %v3501_v37 = vld [vmem:[#allocation32_spill] sm:$0xff] }
 0x1ae   :  { %v2418_v51 = vadd.f32 %v2417_v24, %v2416_v23  ;;  %v2412_v24 = vadd.f32 %v2411_v52, %v2410_v11 }
 0x1af   :  { %v2419_v15 = vpop.f32.mrf.mxu0  ;;  %v1641_v38 = vadd.f32 %v2403_v1, %v1480_v14  ;;  %v1725_v14 = vmul.f32 0.01, %v3501_v37 }
 0x1b1   :  { %v2420_v56 = vpop.f32.mrf.mxu0 }
 0x1b2   :  { %v2421_v4 = vadd.f32 %v2420_v56, %v2419_v15  ;;  %v1501_v15 = vadd.f32 %v2306_v0, %v1340_v40  ;;  %v2415_v56 = vadd.f32 %v2414_v16, %v2413_v25  ;;  %v2294_v25 = vadd.f32 %v3233_v7, %v3229_v45 }
 0x1b3   :  { %v2422_v8 = vpop.f32.mrf.mxu0  ;;  %v1493_v16 = vadd.f32 %v2300_v3, %v1332_v19  ;;  %v2406_v45 = vadd.f32 %v3255_v33, %v3253_v44  ;;  %v3481_v33 = vld [vmem:[#allocation29_spill] sm:$0xff]  ;;  %v3491_v3 = vld [vmem:[#allocation27_spill] sm:$0xff] }
 0x1b4   :  { %v1665_v62 = vadd.f32 %v2421_v4, %v1504_v55  ;;  %v1662_v23 = vadd.f32 %v2418_v51, %v1501_v15  ;;  %v1657_v42 = vadd.f32 %v2415_v56, %v1496_v53  ;;  %v1485_v46 = vadd.f32 %v2294_v25, %v3275_v27  ;;  %v3485_v27 = vld [vmem:[#allocation39_spill] sm:$0xff]  ;;  %v3488_v4 = vld [vmem:[#allocation37_spill] sm:$0xff] }
 0x1b5   :  { %v2423_v20 = vpop.f32.mrf.mxu0  ;;  %v1654_v7 = vadd.f32 %v2412_v24, %v1493_v16  ;;  %v2285_v32 = vadd.f32 %v3482_v26, %v3481_v33  ;;  %v1716_v15 = vmul.f32 0.01, %v3491_v3  ;;  %v1750_v56 = vsel %vm1686_vm11, %v3190_v2, %v3292_v60  ;;  %v3493_v60 = vld [vmem:[#allocation23_spill] sm:$0xff]  ;;  %v3494_v16 = vld [vmem:[#allocation22_spill] sm:$0xff] }
 0x1b6   :  { %v2424_v31 = vadd.f32 %v2423_v20, %v2422_v8  ;;  %v3298_v8 = vmul.f32 0.01, %v3197_v35  ;;  %v1721_v20 = vmul.f32 0.01, %v3200_v18  ;;  %v1737_v11 = vmul.f32 0.01, %v1665_v62 }
 0x1b7   :  { %v2425_v43 = vpop.f32.mrf.mxu0  ;;  %vm1705_vm7 = vcmp.ge.f32.partialorder %v1665_v62, 0.0  ;;  %v1736_v49 = vmul.f32 0.01, %v1662_v23  ;;  %vm1704_vm8 = vcmp.ge.f32.partialorder %v1662_v23, 0.0  ;;  %v1735_v44 = vmul.f32 0.01, %v1657_v42 }
 0x1b8   :  { %v1670_v10 = vadd.f32 %v2424_v31, %v1509_v61  ;;  %v1769_v22 = vsel %vm1705_vm7, %v1665_v62, %v1737_v11  ;;  %v1753_v5 = vsel %vm1689_vm0, %v3200_v18, %v1721_v20  ;;  %vm1703_vm9 = vcmp.ge.f32.partialorder %v1657_v42, 0.0  ;;  %v3487_v18 = vld [vmem:[#allocation35_spill] sm:$0xff]  ;;  %v3495_v11 = vld [vmem:[#allocation36_spill] sm:$0xff] }
 0x1b9   :  { %v2426_v59 = vpop.f32.mrf.mxu0  ;;  %v2400_v31 = vadd.f32 %v3485_v27, %v3484_v28  ;;  %v1646_v40 = vadd.f32 %v2406_v45, %v1485_v46  ;;  %v1768_v48 = vsel %vm1704_vm8, %v1662_v23, %v1736_v49  ;;  %v1734_v17 = vmul.f32 0.01, %v1654_v7 }
 0x1ba   :  { %v2427_v57 = vadd.f32 %v2426_v59, %v2425_v43  ;;  %v1738_v12 = vmul.f32 0.01, %v1670_v10  ;;  %vm1706_vm5 = vcmp.ge.f32.partialorder %v1670_v10, 0.0  ;;  %v3486_v43 = vld [vmem:[#allocation41_spill] sm:$0xff]  ;;  %v1752_v61 = vsel %vm1688_vm1, %v3197_v35, %v3298_v8  ;;  %v3490_v35 = vld [vmem:[#allocation40_spill] sm:$0xff] }
 0x1bb   :  { %v1477_v0 = vadd.f32 %v2288_v21, %v3486_v43  ;;  %vm1702_vm10 = vcmp.ge.f32.partialorder %v1654_v7, 0.0  ;;  %v2397_v20 = vadd.f32 %v3488_v4, %v3487_v18  ;;  %v1767_v55 = vsel %vm1703_vm9, %v1657_v42, %v1735_v44  ;;  %v3498_v21 = vld [vmem:[#allocation20_spill] sm:$0xff]  ;;  %v3500_v44 = vld [vmem:[#allocation19_spill] sm:$0xff] }
 0x1bc   :  { %v1673_v41 = vadd.f32 %v2427_v57, %v1512_v30  ;;  %v1770_v19 = vsel %vm1706_vm5, %v1670_v10, %v1738_v12  ;;  %v1733_v59 = vmul.f32 0.01, %v1649_v36  ;;  %v3489_v30 = vld [vmem:[#allocation28_spill] sm:$0xff]  ;;  %v1751_v10 = vsel %vm1687_vm4, %v3194_v39, %v3295_v9 }
 0x1bd   :  { %v1717_v51 = vmul.f32 0.01, %v3489_v30  ;;  %vm1685_vm13 = vcmp.ge.f32.partialorder %v3489_v30, 0.0  ;;  %v1472_v8 = vadd.f32 %v2285_v32, %v3490_v35  ;;  %v1638_v57 = vadd.f32 %v2400_v31, %v1477_v0  ;;  %v3505_v0 = vld [vmem:[#allocation24_spill] sm:$0xff] }
 0x1be   :  { %vm1707_vm3 = vcmp.ge.f32.partialorder %v1673_v41, 0.0  ;;  %v1739_v13 = vmul.f32 0.01, %v1673_v41  ;;  %v1766_v54 = vsel %vm1702_vm10, %v1654_v7, %v1734_v17  ;;  %v1732_v50 = vmul.f32 0.01, %v1646_v40  ;;  %v3504_v17 = vld [vmem:[#allocation17_spill] sm:$0xff] }
 0x1bf   :  { %vm1700_vm14 = vcmp.ge.f32.partialorder %v1646_v40, 0.0  ;;  %v1633_v62 = vadd.f32 %v2397_v20, %v1472_v8  ;;  %v1765_v39 = vsel %vm1701_vm12, %v1649_v36, %v1733_v59  ;;  %vm1684_vm15 = vcmp.ge.f32.partialorder %v3491_v3, 0.0  ;;  %v3499_v36 = vld [vmem:[#allocation33_spill] sm:$0xff]  ;;  %v3506_v20 = vld [vmem:[#allocation26_spill] sm:$0xff] }
 0x1c0   :  { %v1771_v52 = vsel %vm1707_vm3, %v1673_v41, %v1739_v13  ;;  %v1731_v9 = vmul.f32 0.01, %v1641_v38  ;;  %v3492_v41 = vld [vmem:[#allocation25_spill] sm:$0xff]  ;;  %v1749_v53 = vsel %vm1685_vm13, %v3489_v30, %v1717_v51  ;;  %vm1699_vm0 = vcmp.ge.f32.partialorder %v1641_v38, 0.0  ;;  %v1777_v51 = vpop.permute.xlu0 %1776 }
 0x1c1   :  { %2428 = vmatprep.subr.mxu1 %v1771_v52  ;;  %v1715_v6 = vmul.f32 0.01, %v3492_v41  ;;  %v1764_v24 = vsel %vm1700_vm14, %v1646_v40, %v1732_v50  ;;  %vm1683_vm1 = vcmp.ge.f32.partialorder %v3492_v41, 0.0  ;;  %v1730_v2 = vmul.f32 0.01, %v1638_v57  ;;  %v3503_v40 = vld [vmem:[#allocation30_spill] sm:$0xff] }
 0x1c2   :  { %2429 = vmatpush3.msra.mxu1 %v1755_v47  ;;  %v1714_v23 = vmul.f32 0.01, %v3493_v60  ;;  %v1748_v13 = vsel %vm1684_vm15, %v3491_v3, %v1716_v15  ;;  %vm1698_vm2 = vcmp.ge.f32.partialorder %v1638_v57, 0.0  ;;  %v1763_v12 = vsel %vm1699_vm0, %v1641_v38, %v1731_v9  ;;  %v1864_v50 = vld [vmem:[%s3420_s5] sm:$0x1]  ;;  %s2736_s5 = smov [#allocation6]  }
 0x1c3   :  { %2430 = vmatprep.subr.mxu1 %v1770_v19  ;;  %vm1682_vm3 = vcmp.ge.f32.partialorder %v3493_v60, 0.0  ;;  %v1729_v25 = vmul.f32 0.01, %v1633_v62  ;;  %v1713_v63 = vmul.f32 0.01, %v3494_v16  ;;  %v1747_v42 = vsel %vm1683_vm1, %v3492_v41, %v1715_v6  ;;  %v3497_v19 = vld [vmem:[#allocation34_spill] sm:$0xff] }
 0x1c4   :  { %2431 = vmatpush3.msra.mxu1 %v1754_v29  ;;  %vm1697_vm4 = vcmp.ge.f32.partialorder %v1633_v62, 0.0  ;;  %v1762_v52 = vsel %vm1698_vm2, %v1638_v57, %v1730_v2  ;;  %vm1681_vm5 = vcmp.ge.f32.partialorder %v3494_v16, 0.0  ;;  %v1728_v58 = vmul.f32 0.01, %v3495_v11  ;;  %s1937_s10 = sshll.u32 %s2736_s5, 4  ;;  %s1938_s10 = int_to_ptr.vmem [resolvable:$true] %s1937_s10 }
 0x1c5   :  { %2432 = vmatprep.subr.mxu1 %v1769_v22  ;;  %v1712_v47 = vmul.f32 0.01, %v3496_v34  ;;  %v1746_v45 = vsel %vm1682_vm3, %v3493_v60, %v1714_v23  ;;  %vm1696_vm6 = vcmp.ge.f32.partialorder %v3495_v11, 0.0  ;;  %v1761_v7 = vsel %vm1697_vm4, %v1633_v62, %v1729_v25  ;;  %s2707_s1 = scalar_lea.vmem %s1938_s10, 64  ;;  %p2712_p6 = scmp.lt.s32.totalorder %s1938_s10, %s1938_s10 }
 0x1c6   :  { %2433 = vmatpush3.msra.mxu1 %v1753_v5  ;;  %vm1680_vm7 = vcmp.ge.f32.partialorder %v3496_v34, 0.0  ;;  %v1727_v49 = vmul.f32 0.01, %v3497_v19  ;;  %v1711_v46 = vmul.f32 0.01, %v3498_v21  ;;  %v1745_v29 = vsel %vm1681_vm5, %v3494_v16, %v1713_v63  ;;  %v3502_v5 = vld [vmem:[#allocation18_spill] sm:$0xff]  ;;  %p2708_p5 = scmp.ne.s32.totalorder %s1938_s10, %s2707_s1  ;;  %p2713_p7 = scmp.lt.s32.totalorder %s2707_s1, %s2707_s1 }
 0x1c7   :  { %2434 = vmatprep.subr.mxu1 %v1768_v48  ;;  %vm1695_vm8 = vcmp.ge.f32.partialorder %v3497_v19, 0.0  ;;  %v1760_v1 = vsel %vm1696_vm6, %v3495_v11, %v1728_v58  ;;  %vm1679_vm9 = vcmp.ge.f32.partialorder %v3498_v21, 0.0  ;;  %v1726_v22 = vmul.f32 0.01, %v3499_v36 }
 0x1c8   :  { %2435 = vmatpush3.msra.mxu1 %v1752_v61  ;;  %v1710_v33 = vmul.f32 0.01, %v3500_v44  ;;  %v1744_v26 = vsel %vm1680_vm7, %v3496_v34, %v1712_v47  ;;  %vm1694_vm10 = vcmp.ge.f32.partialorder %v3499_v36, 0.0  ;;  %v1759_v32 = vsel %vm1695_vm8, %v3497_v19, %v1727_v49  ;;  %p2714_p8 = por %p2713_p7, %p2712_p6 }
 0x1c9   :  { %2436 = vmatprep.subr.mxu1 %v1767_v55  ;;  %vm1678_vm11 = vcmp.ge.f32.partialorder %v3500_v44, 0.0  ;;  %v1709_v28 = vmul.f32 0.01, %v3502_v5  ;;  %v1743_v27 = vsel %vm1679_vm9, %v3498_v21, %v1711_v46  ;;  %vm1693_vm12 = vcmp.ge.f32.partialorder %v3501_v37, 0.0 }
 0x1ca   :  { %2437 = vmatpush3.msra.mxu1 %v1751_v10  ;;  %v1758_v31 = vsel %vm1694_vm10, %v3499_v36, %v1726_v22  ;;  %vm1677_vm13 = vcmp.ge.f32.partialorder %v3502_v5, 0.0  ;;  %v1724_v48 = vmul.f32 0.01, %v3503_v40  ;;  %v1708_v43 = vmul.f32 0.01, %v3504_v17  ;;  %p2715_p9 = pnand %p2714_p8, %p2708_p5 }
 0x1cb   :  { %2438 = vmatprep.subr.mxu1 %v1766_v54  ;;  %v1781_v61 = vsub.s32 0, %v3505_v0  ;;  %v1742_v18 = vsel %vm1678_vm11, %v3500_v44, %v1710_v33  ;;  %vm1692_vm14 = vcmp.ge.f32.partialorder %v3503_v40, 0.0  ;;  %v1757_v4 = vsel %vm1693_vm12, %v3501_v37, %v1725_v14 }
 0x1cc   :  { %2439 = vmatpush3.msra.mxu1 %v1750_v56  ;;  %vm1676_vm15 = vcmp.ge.f32.partialorder %v3504_v17, 0.0  ;;  %v1741_v55 = vsel %vm1677_vm13, %v3502_v5, %v1709_v28  ;;  %v1756_v59 = vsel %vm1692_vm14, %v3503_v40, %v1724_v48  ;;  %vm1911_vm0 = vcmask 57344  }
 0x1cd   :  { %2440 = vmatprep.subr.mxu1 %v1765_v39  ;;  %v1787_v38 = vrot.slane %v3506_v20, %v1781_v61  ;;  %v1740_v30 = vsel %vm1676_vm15, %v3504_v17, %v1708_v43  ;;  %v1782_v8 = vrot.slane %v1777_v51, %v1781_v61  ;;  %v2735_v15 = vmov 0.0  }
 0x1ce   :  { %2441 = vmatpush3.msra.mxu1 %v1749_v53 }
 0x1cf   :  { %2442 = vmatprep.subr.mxu1 %v1764_v24 }
 0x1d0   :  { %2443 = vmatpush3.msra.mxu1 %v1748_v13 }
 0x1d1   :  { %2444 = vmatprep.subr.mxu1 %v1763_v12 }
 0x1d2   :  { %2445 = vmatpush3.msra.mxu1 %v1747_v42 }
 0x1d3   :  { %2446 = vmatprep.subr.mxu1 %v1762_v52 }
 0x1d4   :  { %2447 = vmatpush3.msra.mxu1 %v1746_v45 }
 0x1d5   :  { %2448 = vmatprep.subr.mxu1 %v1761_v7 }
 0x1d6   :  { %2449 = vmatpush3.msra.mxu1 %v1745_v29 }
 0x1d7   :  { %2450 = vmatprep.subr.mxu1 %v1760_v1 }
 0x1d8   :  { %2451 = vmatpush3.msra.mxu1 %v1744_v26  ;;  %v1905_v26 = vmul.f32 2.0, %v1864_v50 }
 0x1d9   :  { %2452 = vmatprep.subr.mxu1 %v1759_v32  ;;  %v1907_v32 = vsub.f32 1.0, %v1864_v50 }
 0x1da   :  { %2453 = vmatpush3.msra.mxu1 %v1743_v27 }
 0x1db   :  { %2454 = vmatprep.subr.mxu1 %v1758_v31 }
 0x1dc   :  { %2455 = vmatpush3.msra.mxu1 %v1742_v18 }
 0x1dd   :  { %2456 = vmatprep.subr.mxu1 %v1757_v4 }
 0x1de   :  { %2457 = vmatpush3.msra.mxu1 %v1741_v55 }
 0x1df   :  { %2458 = vmatprep.subr.mxu1 %v1756_v59 }
 0x1e0   :  { %2459 = vmatpush3.msra.mxu1 %v1740_v30 }
 0x1e1   :  { %1859 = vmatmul.mubr.f32.vlgmr.msra.gmra.mxu1 %v1787_v38 }
 0x2a1   :  { %v2460_v10 = vpop.f32.mrf.mxu1 }
 0x2a3   :  { %v2461_v35 = vpop.f32.mrf.mxu1 }
 0x2a4   :  { %v2462_v57 = vadd.f32 %v2461_v35, %v2460_v10 }
 0x2a6   :  { %v1861_v54 = vadd.f32 %v2462_v57, %v1782_v8 }
 0x2a8   :  { %v1865_v3 = vsub.f32 0.0, %v1861_v54  ;;  %vm1917_vm1 = vcmp.gt.f32.partialorder %v1861_v54, 0.0  ;;  %1927 = vst.msk [vmem:[#allocation6] sm:$0x1] %vm1911_vm0, %v1861_v54  ;;  %v1886_v19 = vmax.f32 %v1861_v54, 0.0 }
 0x2a9   :  { %v2090_v56 = vsel %vm1917_vm1, 1.0, %v2735_v15 }
 0x2aa   :  { %v1889_v62 = vand.u32 2147483647, %v1865_v3  ;;  %vm1920_vm2 = vcmp.eq.f32.partialorder %v2090_v56, %v1864_v50  ;;  %1928 = vst.msk [vmem:[#allocation6 + $0x1] sm:$0x1] %vm1911_vm0, %v2090_v56  ;;  %v1867_v39 = vsub.f32 0.0, %v1865_v3  ;;  %v1866_v29 = vmax.f32 %v1865_v3, 0.0 }
 0x2ab   :  { %v2091_v9 = vsel %vm1920_vm2, 1.0, %v2735_v15  ;;  %vm1887_vm5 = vcmp.ne.f32.partialorder %v1865_v3, %v1865_v3 }
 0x2ac   :  { %v1890_v41 = vsub.f32 0.0, %v1889_v62  ;;  %v1923_v6 = vsel %vm1911_vm0, %v2091_v9, 0.0  ;;  %v1870_v53 = vand.u32 2147483647, %v1867_v39  ;;  %vm1868_vm6 = vcmp.ne.f32.partialorder %v1867_v39, %v1867_v39 }
 0x2ad   :  { %1924 = vadd.xlane.f32.xlu0 %v1923_v6 }
 0x2ae   :  { %v1891_v24 = vmul.f32 1.442695, %v1890_v41  ;;  %v1871_v2 = vsub.f32 0.0, %v1870_v53 }
 0x2b0   :  { %2679 = vpow2.f32 %v1891_v24  ;;  %v1872_v60 = vmul.f32 1.442695, %v1871_v2 }
 0x2b2   :  { %2681 = vpow2.f32 %v1872_v60 }
 0x2bd   :  { %v2680_v23 = vpop.eup %2679 }
 0x2be   :  { %v1893_v13 = vadd.f32 1.0, %v2680_v23  ;;  %v1896_v16 = vmul.f32 -0.5, %v2680_v23  ;;  %v1899_v52 = vand.u32 2147483647, %v2680_v23 }
 0x2bf   :  { %v2682_v12 = vpop.eup %2681 }
 0x2c0   :  { %v1874_v25 = vadd.f32 1.0, %v2682_v12  ;;  %2683 = vlog2.f32 %v1893_v13  ;;  %v1877_v63 = vmul.f32 -0.5, %v2682_v12  ;;  %v1897_v42 = vadd.f32 1.0, %v1896_v16 }
 0x2c1   :  { %v1880_v34 = vand.u32 2147483647, %v2682_v12  ;;  %vm1900_vm3 = vcmp.lt.f32.partialorder %v1899_v52, 0.0004427343 }
 0x2c2   :  { %2685 = vlog2.f32 %v1874_v25  ;;  %v1878_v11 = vadd.f32 1.0, %v1877_v63  ;;  %v1898_v45 = vmul.f32 %v2680_v23, %v1897_v42 }
 0x2c3   :  { %vm1881_vm4 = vcmp.lt.f32.partialorder %v1880_v34, 0.0004427343 }
 0x2c4   :  { %v1879_v21 = vmul.f32 %v2682_v12, %v1878_v11 }
 0x2cd   :  { %v2684_v58 = vpop.eup %2683 }
 0x2ce   :  { %v1895_v47 = vmul.f32 0.6931472, %v2684_v58 }
 0x2cf   :  { %v2686_v7 = vpop.eup %2685 }
 0x2d0   :  { %v1876_v49 = vmul.f32 0.6931472, %v2686_v7  ;;  %v1901_v46 = vsel %vm1900_vm3, %v1898_v45, %v1895_v47 }
 0x2d1   :  { %v1902_v1 = vadd.f32 %v1901_v46, %v1886_v19 }
 0x2d2   :  { %v1882_v36 = vsel %vm1881_vm4, %v1879_v21, %v1876_v49 }
 0x2d3   :  { %v1883_v22 = vadd.f32 %v1882_v36, %v1866_v29  ;;  %v1903_v44 = vsel %vm1887_vm5, %v1861_v54, %v1902_v1 }
 0x2d4   :  { %v1904_v33 = vsub.f32 0.0, %v1903_v44 }
 0x2d5   :  { %v1884_v37 = vsel %vm1868_vm6, %v1865_v3, %v1883_v22 }
 0x2d6   :  { %v1885_v14 = vsub.f32 0.0, %v1884_v37  ;;  %v1908_v28 = vmul.f32 %v1907_v32, %v1904_v33 }
 0x2d8   :  { %v1906_v5 = vmul.f32 %v1905_v26, %v1885_v14 }
 0x2da   :  { %v1909_v27 = vadd.f32 %v1908_v28, %v1906_v5 }
 0x2dc   :  { %v1910_v31 = vsub.f32 0.0, %v1909_v27 }
 0x2de   :  { %v1912_v40 = vsel %vm1911_vm0, %v1910_v31, 0.0 }
 0x2df   :  { %1913 = vadd.xlane.f32.xlu1 %v1912_v40 }
 0x336   :  { %v1925_v48 = vpop.xlane.xlu0 %1924 }
 0x337   :  { %v1926_v17 = vmul.f32 0.125, %v1925_v48 }
 0x339   :  { %1930 = vst.msk [vmem:[#allocation6 + $0x3] sm:$0x1] %vm1911_vm0, %v1926_v17 }
 0x368   :  { %v1914_v43 = vpop.xlane.xlu1 %1913 }
 0x369   :  { %v1916_v0 = vmul.f32 0.125, %v1914_v43 }
 0x36b   :  { %1929 = vst.msk [vmem:[#allocation6 + $0x2] sm:$0x1] %vm1911_vm0, %v1916_v0 }
 0x36c   :  { %2718 = shalt.err (!%p2715_p9)
}
 0x36d   :  { %1940 = dma.vmem_to_hbm [thread:$0]  %s1938_s10, 64, %s3421_s6, [#allocation5]  }
 0x36e   :  { %2729 = dma.done.wait [#allocation5], 64  }
 0x36f   :  { %2730 = vsyncadd [#allocation5], 4294967232 }
 0x370   :  { %1944 = vsyncpa [#allocation4], 1 }
 0x371   :  { %1945 = vsyncpa [#allocation5], 1 }

</bundles_post_ra>
